<compile_context>
chip_gen: v6e
topology: v6e:2x2x1
jax: 0.10.0
libtpu: 0.0.40
codegen_flags: <defaults>
</compile_context>

<pallas_src>
import jax
import jax.numpy as jnp
from jax.experimental import pallas as pl
from jax.experimental.pallas import tpu as pltpu
import numpy as np


def mlp_kernel(x_ref, w_hbm, out_ref, std_ref, wbuf, sem):
    """Whole MLP forward in one kernel invocation.

    x_ref:   (B, N)     input activations (VMEM)
    w_hbm:   (L, N, N)  weight stack in HBM, already transposed to (in, out)
    out_ref: (B, N)     final activations (VMEM)
    std_ref: (1, L)     per-layer unbiased std (torch.Tensor.std(), ddof=1)
    wbuf:    (2, N, N)  VMEM scratch: double-buffered per-layer weights
    sem:     (2,)       DMA completion semaphores
    """
    L = w_hbm.shape[0]
    h = x_ref[...].astype(jnp.float32)
    n = h.shape[0] * h.shape[1]
    inv_n = 1.0 / n
    inv_nm1 = 1.0 / (n - 1)

    # Prime the double buffer: layer-0 weights into slot 0.
    pltpu.make_async_copy(w_hbm.at[0], wbuf.at[0], sem.at[0]).start()

    sq_sums = []
    # L is small and static -> fully unrolled layer loop (no grid-step
    # overhead, LLO scheduler sees all DMAs + matmuls at once).
    for l in range(L):
        slot = l & 1
        # Wait for this layer's weights, then immediately prefetch the next
        # layer into the other slot so its DMA overlaps this layer's matmul.
        pltpu.make_async_copy(w_hbm.at[l], wbuf.at[slot], sem.at[slot]).wait()
        if l + 1 < L:
            pltpu.make_async_copy(
                w_hbm.at[l + 1], wbuf.at[1 - slot], sem.at[1 - slot]).start()

        h = jnp.dot(h, wbuf[slot], preferred_element_type=jnp.float32)
        h = jnp.maximum(h, 0.0)                      # relu

        # Two-pass variance: only the reductions stay in the loop (they branch
        # off h and can overlap the next matmul); divide/sqrt/store deferred.
        mean = jnp.sum(h) * inv_n
        d = h - mean
        sq_sums.append(jnp.sum(d * d))

    # Epilogue: assemble all L stds into one (1, L) row -> single vector store
    # instead of L masked lane-sparse 1x1 stores.
    lane = jax.lax.broadcasted_iota(jnp.int32, (1, L), 1)
    ss_row = jnp.zeros((1, L), jnp.float32)
    for l, ss in enumerate(sq_sums):
        ss_row = jnp.where(lane == l, ss, ss_row)
    std_ref[...] = jnp.sqrt(ss_row * inv_nm1)

    # TODO(synk): the PyTorch forward breaks out of the layer loop when std is
    # NaN; the loop here is static, so all layers always run (identical result
    # for non-NaN runs). The host-side print loop below reproduces the break.

    out_ref[...] = h.astype(out_ref.dtype)


@jax.jit
def mlp_forward(x, wt):
    """x: (B, N) f32; wt: (L, N, N) f32 ALREADY transposed to (in, out).

    Returns (final_x, per_layer_std) with per_layer_std of shape (1, L).
    """
    L, N, _ = wt.shape
    B = x.shape[0]

    out, stds = pl.pallas_call(
        mlp_kernel,
        out_shape=(jax.ShapeDtypeStruct((B, N), x.dtype),
                   jax.ShapeDtypeStruct((1, L), jnp.float32)),
        grid_spec=pltpu.PrefetchScalarGridSpec(
            num_scalar_prefetch=0,
            grid=(1,),                                       # single invocation
            in_specs=[
                pl.BlockSpec((B, N), lambda i: (0, 0)),      # activations -> VMEM
                pl.BlockSpec(memory_space=pl.ANY),           # weights stay in HBM
            ],
            out_specs=[
                pl.BlockSpec((B, N), lambda i: (0, 0)),      # final output
                pl.BlockSpec((1, L), lambda i: (0, 0)),      # per-layer std
            ],
            scratch_shapes=[
                pltpu.VMEM((2, N, N), jnp.float32),          # weight double buffer
                pltpu.SemaphoreType.DMA((2,)),
            ],
        ),
        compiler_params=pltpu.CompilerParams(
            dimension_semantics=("arbitrary",)),
    )(x, wt)
    return out, stds


def mlp_reference(x, w):
    """Pure-JAX reference of the PyTorch forward (no NaN early-break)."""
    h = x
    for l in range(w.shape[0]):
        h = jnp.maximum(h @ w[l].T, 0.0)
    return h


if __name__ == "__main__":
    # MLP(neural_num=128, layers=6), batch=8 — small, tile-friendly shapes.
    B, N, L = 8, 128, 6

    key = jax.random.PRNGKey(0)
    kx, kw = jax.random.split(key)

    x = jax.random.normal(kx, (B, N), dtype=jnp.float32)

    # nn.init.kaiming_normal_ on an (N, N) Linear weight: std = sqrt(2 / fan_in)
    kaiming_std = np.sqrt(2.0 / N).astype(np.float32)
    w = jax.random.normal(kw, (L, N, N), dtype=jnp.float32) * kaiming_std

    # One-time weight prep (OUTSIDE the per-call jit path):
    # nn.Linear (L, out, in) -> (L, in, out).
    wt = jax.block_until_ready(jnp.transpose(w, (0, 2, 1)))

    out, stds = mlp_forward(x, wt)
    out = jax.block_until_ready(out)
    stds = jax.block_until_ready(stds)

    # reproduce the module's per-layer prints (including the NaN early-break)
    for i in range(L):
        s = float(stds[0, i])
        print("layer:{}, std:{}".format(i, s))
        if np.isnan(s):
            print("output is nan in {} layers".format(i))
            break

    # sanity check vs pure-JAX reference
    ref = mlp_reference(x, w)
    np.testing.assert_allclose(np.asarray(out), np.asarray(ref), rtol=1e-5, atol=1e-5)

    # per-layer std sanity check vs numpy (ddof=1 over all elements)
    h_np = np.asarray(x)
    w_np = np.asarray(w)
    for i in range(L):
        h_np = np.maximum(h_np @ w_np[i].T, 0.0)
        np.testing.assert_allclose(float(stds[0, i]), h_np.std(ddof=1),
                                   rtol=1e-4, atol=1e-6)

    print("KERNEL_OK")
</pallas_src>

<mosaic_0001>
module attributes {stable_mosaic.version = 11 : i64} {
  func.func @mlp_kernel(%arg0: i32, %arg1: memref<8x128xf32, #tpu.memory_space<vmem>>, %arg2: memref<6x128x128xf32, #tpu.memory_space<any>>, %arg3: memref<8x128xf32, #tpu.memory_space<vmem>>, %arg4: memref<1x6xf32, #tpu.memory_space<vmem>>, %arg5: memref<2x128x128xf32, #tpu.memory_space<vmem>>, %arg6: memref<2x!tpu.dma_semaphore, #tpu.memory_space<semaphore_mem>>) attributes {dimension_semantics = [#tpu.dimension_semantics<arbitrary>], iteration_bounds = array<i64: 1>, scalar_prefetch = 0 : i64, scratch_operands = 2 : i64, tpu.core_type = #tpu.core_type<tc>, window_params = [{pipeline_mode = #tpu.pipeline_mode<synchronous>, transform_indices = @transform_0, window_bounds = array<i64: 8, 128>}, {}, {pipeline_mode = #tpu.pipeline_mode<synchronous>, transform_indices = @transform_2, window_bounds = array<i64: 8, 128>}, {pipeline_mode = #tpu.pipeline_mode<synchronous>, transform_indices = @transform_3, window_bounds = array<i64: 1, 6>}]} {
    %c0 = arith.constant 0 : index
    %c0_0 = arith.constant 0 : index
    %0 = vector.load %arg1[%c0, %c0_0] : memref<8x128xf32, #tpu.memory_space<vmem>>, vector<8x128xf32>
    %c0_i32 = arith.constant 0 : i32
    %c0_i32_1 = arith.constant 0 : i32
    %c0_i32_2 = arith.constant 0 : i32
    %c0_i32_3 = arith.constant 0 : i32
    %c0_i32_4 = arith.constant 0 : i32
    %1 = tpu.memref_slice %arg2[%c0_i32, %c0_i32_3, %c0_i32_4] : memref<6x128x128xf32, #tpu.memory_space<any>> -> memref<1x128x128xf32, #tpu.memory_space<any>>
    %2 = tpu.memref_squeeze %1 : memref<1x128x128xf32, #tpu.memory_space<any>> -> memref<128x128xf32, #tpu.memory_space<any>>
    %c0_i32_5 = arith.constant 0 : i32
    %c0_i32_6 = arith.constant 0 : i32
    %3 = tpu.memref_slice %arg5[%c0_i32_1, %c0_i32_5, %c0_i32_6] : memref<2x128x128xf32, #tpu.memory_space<vmem>> -> memref<1x128x128xf32, #tpu.memory_space<vmem>>
    %4 = tpu.memref_squeeze %3 : memref<1x128x128xf32, #tpu.memory_space<vmem>> -> memref<128x128xf32, #tpu.memory_space<vmem>>
    %5 = tpu.memref_slice %arg6[%c0_i32_2] : memref<2x!tpu.dma_semaphore, #tpu.memory_space<semaphore_mem>> -> memref<1x!tpu.dma_semaphore, #tpu.memory_space<semaphore_mem>>
    %6 = tpu.memref_squeeze %5 : memref<1x!tpu.dma_semaphore, #tpu.memory_space<semaphore_mem>> -> memref<!tpu.dma_semaphore, #tpu.memory_space<semaphore_mem>>
    tpu.enqueue_dma source(%2 : memref<128x128xf32, #tpu.memory_space<any>>) target(%4 : memref<128x128xf32, #tpu.memory_space<vmem>>) target_semaphore(%6 : memref<!tpu.dma_semaphore, #tpu.memory_space<semaphore_mem>>)
    %c0_i32_7 = arith.constant 0 : i32
    %c0_i32_8 = arith.constant 0 : i32
    %c0_i32_9 = arith.constant 0 : i32
    %c0_i32_10 = arith.constant 0 : i32
    %c0_i32_11 = arith.constant 0 : i32
    %7 = tpu.memref_slice %arg2[%c0_i32_7, %c0_i32_10, %c0_i32_11] : memref<6x128x128xf32, #tpu.memory_space<any>> -> memref<1x128x128xf32, #tpu.memory_space<any>>
    %8 = tpu.memref_squeeze %7 : memref<1x128x128xf32, #tpu.memory_space<any>> -> memref<128x128xf32, #tpu.memory_space<any>>
    %c0_i32_12 = arith.constant 0 : i32
    %c0_i32_13 = arith.constant 0 : i32
    %9 = tpu.memref_slice %arg5[%c0_i32_8, %c0_i32_12, %c0_i32_13] : memref<2x128x128xf32, #tpu.memory_space<vmem>> -> memref<1x128x128xf32, #tpu.memory_space<vmem>>
    %10 = tpu.memref_squeeze %9 : memref<1x128x128xf32, #tpu.memory_space<vmem>> -> memref<128x128xf32, #tpu.memory_space<vmem>>
    %11 = tpu.memref_slice %arg6[%c0_i32_9] : memref<2x!tpu.dma_semaphore, #tpu.memory_space<semaphore_mem>> -> memref<1x!tpu.dma_semaphore, #tpu.memory_space<semaphore_mem>>
    %12 = tpu.memref_squeeze %11 : memref<1x!tpu.dma_semaphore, #tpu.memory_space<semaphore_mem>> -> memref<!tpu.dma_semaphore, #tpu.memory_space<semaphore_mem>>
    tpu.wait_dma2 semaphore(%12 : memref<!tpu.dma_semaphore, #tpu.memory_space<semaphore_mem>>) src(%8 : memref<128x128xf32, #tpu.memory_space<any>>) dst(%10 : memref<128x128xf32, #tpu.memory_space<vmem>>)
    %c1_i32 = arith.constant 1 : i32
    %c1_i32_14 = arith.constant 1 : i32
    %c1_i32_15 = arith.constant 1 : i32
    %c0_i32_16 = arith.constant 0 : i32
    %c0_i32_17 = arith.constant 0 : i32
    %13 = tpu.memref_slice %arg2[%c1_i32, %c0_i32_16, %c0_i32_17] : memref<6x128x128xf32, #tpu.memory_space<any>> -> memref<1x128x128xf32, #tpu.memory_space<any>>
    %14 = tpu.memref_squeeze %13 : memref<1x128x128xf32, #tpu.memory_space<any>> -> memref<128x128xf32, #tpu.memory_space<any>>
    %c0_i32_18 = arith.constant 0 : i32
    %c0_i32_19 = arith.constant 0 : i32
    %15 = tpu.memref_slice %arg5[%c1_i32_14, %c0_i32_18, %c0_i32_19] : memref<2x128x128xf32, #tpu.memory_space<vmem>> -> memref<1x128x128xf32, #tpu.memory_space<vmem>>
    %16 = tpu.memref_squeeze %15 : memref<1x128x128xf32, #tpu.memory_space<vmem>> -> memref<128x128xf32, #tpu.memory_space<vmem>>
    %17 = tpu.memref_slice %arg6[%c1_i32_15] : memref<2x!tpu.dma_semaphore, #tpu.memory_space<semaphore_mem>> -> memref<1x!tpu.dma_semaphore, #tpu.memory_space<semaphore_mem>>
    %18 = tpu.memref_squeeze %17 : memref<1x!tpu.dma_semaphore, #tpu.memory_space<semaphore_mem>> -> memref<!tpu.dma_semaphore, #tpu.memory_space<semaphore_mem>>
    tpu.enqueue_dma source(%14 : memref<128x128xf32, #tpu.memory_space<any>>) target(%16 : memref<128x128xf32, #tpu.memory_space<vmem>>) target_semaphore(%18 : memref<!tpu.dma_semaphore, #tpu.memory_space<semaphore_mem>>)
    %c0_20 = arith.constant 0 : index
    %c0_21 = arith.constant 0 : index
    %c0_22 = arith.constant 0 : index
    %19 = vector.load %arg5[%c0_20, %c0_21, %c0_22] : memref<2x128x128xf32, #tpu.memory_space<vmem>>, vector<1x128x128xf32>
    %20 = vector.shape_cast %19 : vector<1x128x128xf32> to vector<128x128xf32>
    %cst = arith.constant dense<0.000000e+00> : vector<8x128xf32>
    %21 = tpu.matmul %0, %20, %cst {dimension_numbers = #tpu.dot_dimension_numbers<[1], [0], [0], [1], [0, 0, 1, 1], [], []>} : vector<8x128xf32>, vector<128x128xf32>, vector<8x128xf32> -> vector<8x128xf32>
    %cst_23 = arith.constant 0.000000e+00 : f32
    %22 = vector.broadcast %cst_23 : f32 to vector<8x128xf32>
    %23 = arith.maximumf %21, %22 : vector<8x128xf32>
    %24 = vector.shape_cast %23 : vector<8x128xf32> to vector<1x8x128xf32>
    %cst_24 = arith.constant dense<0.000000e+00> : vector<1xf32>
    %25 = vector.multi_reduction <add>, %24, %cst_24 [1, 2] : vector<1x8x128xf32> to vector<1xf32>
    %26 = vector.shape_cast %25 : vector<1xf32> to vector<1x1x1xf32>
    %27 = vector.extract %26[0, 0, 0] : f32 from vector<1x1x1xf32>
    %cst_25 = arith.constant 9.765625E-4 : f32
    %28 = arith.mulf %27, %cst_25 : f32
    %29 = vector.broadcast %28 : f32 to vector<8x128xf32>
    %30 = arith.subf %23, %29 : vector<8x128xf32>
    %31 = arith.mulf %30, %30 : vector<8x128xf32>
    %32 = vector.shape_cast %31 : vector<8x128xf32> to vector<1x8x128xf32>
    %cst_26 = arith.constant dense<0.000000e+00> : vector<1xf32>
    %33 = vector.multi_reduction <add>, %32, %cst_26 [1, 2] : vector<1x8x128xf32> to vector<1xf32>
    %34 = vector.shape_cast %33 : vector<1xf32> to vector<1x1x1xf32>
    %35 = vector.extract %34[0, 0, 0] : f32 from vector<1x1x1xf32>
    %c1_i32_27 = arith.constant 1 : i32
    %c1_i32_28 = arith.constant 1 : i32
    %c1_i32_29 = arith.constant 1 : i32
    %c0_i32_30 = arith.constant 0 : i32
    %c0_i32_31 = arith.constant 0 : i32
    %36 = tpu.memref_slice %arg2[%c1_i32_27, %c0_i32_30, %c0_i32_31] : memref<6x128x128xf32, #tpu.memory_space<any>> -> memref<1x128x128xf32, #tpu.memory_space<any>>
    %37 = tpu.memref_squeeze %36 : memref<1x128x128xf32, #tpu.memory_space<any>> -> memref<128x128xf32, #tpu.memory_space<any>>
    %c0_i32_32 = arith.constant 0 : i32
    %c0_i32_33 = arith.constant 0 : i32
    %38 = tpu.memref_slice %arg5[%c1_i32_28, %c0_i32_32, %c0_i32_33] : memref<2x128x128xf32, #tpu.memory_space<vmem>> -> memref<1x128x128xf32, #tpu.memory_space<vmem>>
    %39 = tpu.memref_squeeze %38 : memref<1x128x128xf32, #tpu.memory_space<vmem>> -> memref<128x128xf32, #tpu.memory_space<vmem>>
    %40 = tpu.memref_slice %arg6[%c1_i32_29] : memref<2x!tpu.dma_semaphore, #tpu.memory_space<semaphore_mem>> -> memref<1x!tpu.dma_semaphore, #tpu.memory_space<semaphore_mem>>
    %41 = tpu.memref_squeeze %40 : memref<1x!tpu.dma_semaphore, #tpu.memory_space<semaphore_mem>> -> memref<!tpu.dma_semaphore, #tpu.memory_space<semaphore_mem>>
    tpu.wait_dma2 semaphore(%41 : memref<!tpu.dma_semaphore, #tpu.memory_space<semaphore_mem>>) src(%37 : memref<128x128xf32, #tpu.memory_space<any>>) dst(%39 : memref<128x128xf32, #tpu.memory_space<vmem>>)
    %c2_i32 = arith.constant 2 : i32
    %c0_i32_34 = arith.constant 0 : i32
    %c0_i32_35 = arith.constant 0 : i32
    %c0_i32_36 = arith.constant 0 : i32
    %c0_i32_37 = arith.constant 0 : i32
    %42 = tpu.memref_slice %arg2[%c2_i32, %c0_i32_36, %c0_i32_37] : memref<6x128x128xf32, #tpu.memory_space<any>> -> memref<1x128x128xf32, #tpu.memory_space<any>>
    %43 = tpu.memref_squeeze %42 : memref<1x128x128xf32, #tpu.memory_space<any>> -> memref<128x128xf32, #tpu.memory_space<any>>
    %c0_i32_38 = arith.constant 0 : i32
    %c0_i32_39 = arith.constant 0 : i32
    %44 = tpu.memref_slice %arg5[%c0_i32_34, %c0_i32_38, %c0_i32_39] : memref<2x128x128xf32, #tpu.memory_space<vmem>> -> memref<1x128x128xf32, #tpu.memory_space<vmem>>
    %45 = tpu.memref_squeeze %44 : memref<1x128x128xf32, #tpu.memory_space<vmem>> -> memref<128x128xf32, #tpu.memory_space<vmem>>
    %46 = tpu.memref_slice %arg6[%c0_i32_35] : memref<2x!tpu.dma_semaphore, #tpu.memory_space<semaphore_mem>> -> memref<1x!tpu.dma_semaphore, #tpu.memory_space<semaphore_mem>>
    %47 = tpu.memref_squeeze %46 : memref<1x!tpu.dma_semaphore, #tpu.memory_space<semaphore_mem>> -> memref<!tpu.dma_semaphore, #tpu.memory_space<semaphore_mem>>
    tpu.enqueue_dma source(%43 : memref<128x128xf32, #tpu.memory_space<any>>) target(%45 : memref<128x128xf32, #tpu.memory_space<vmem>>) target_semaphore(%47 : memref<!tpu.dma_semaphore, #tpu.memory_space<semaphore_mem>>)
    %c1 = arith.constant 1 : index
    %c0_40 = arith.constant 0 : index
    %c0_41 = arith.constant 0 : index
    %48 = vector.load %arg5[%c1, %c0_40, %c0_41] : memref<2x128x128xf32, #tpu.memory_space<vmem>>, vector<1x128x128xf32>
    %49 = vector.shape_cast %48 : vector<1x128x128xf32> to vector<128x128xf32>
    %cst_42 = arith.constant dense<0.000000e+00> : vector<8x128xf32>
    %50 = tpu.matmul %23, %49, %cst_42 {dimension_numbers = #tpu.dot_dimension_numbers<[1], [0], [0], [1], [0, 0, 1, 1], [], []>} : vector<8x128xf32>, vector<128x128xf32>, vector<8x128xf32> -> vector<8x128xf32>
    %cst_43 = arith.constant 0.000000e+00 : f32
    %51 = vector.broadcast %cst_43 : f32 to vector<8x128xf32>
    %52 = arith.maximumf %50, %51 : vector<8x128xf32>
    %53 = vector.shape_cast %52 : vector<8x128xf32> to vector<1x8x128xf32>
    %cst_44 = arith.constant dense<0.000000e+00> : vector<1xf32>
    %54 = vector.multi_reduction <add>, %53, %cst_44 [1, 2] : vector<1x8x128xf32> to vector<1xf32>
    %55 = vector.shape_cast %54 : vector<1xf32> to vector<1x1x1xf32>
    %56 = vector.extract %55[0, 0, 0] : f32 from vector<1x1x1xf32>
    %cst_45 = arith.constant 9.765625E-4 : f32
    %57 = arith.mulf %56, %cst_45 : f32
    %58 = vector.broadcast %57 : f32 to vector<8x128xf32>
    %59 = arith.subf %52, %58 : vector<8x128xf32>
    %60 = arith.mulf %59, %59 : vector<8x128xf32>
    %61 = vector.shape_cast %60 : vector<8x128xf32> to vector<1x8x128xf32>
    %cst_46 = arith.constant dense<0.000000e+00> : vector<1xf32>
    %62 = vector.multi_reduction <add>, %61, %cst_46 [1, 2] : vector<1x8x128xf32> to vector<1xf32>
    %63 = vector.shape_cast %62 : vector<1xf32> to vector<1x1x1xf32>
    %64 = vector.extract %63[0, 0, 0] : f32 from vector<1x1x1xf32>
    %c2_i32_47 = arith.constant 2 : i32
    %c0_i32_48 = arith.constant 0 : i32
    %c0_i32_49 = arith.constant 0 : i32
    %c0_i32_50 = arith.constant 0 : i32
    %c0_i32_51 = arith.constant 0 : i32
    %65 = tpu.memref_slice %arg2[%c2_i32_47, %c0_i32_50, %c0_i32_51] : memref<6x128x128xf32, #tpu.memory_space<any>> -> memref<1x128x128xf32, #tpu.memory_space<any>>
    %66 = tpu.memref_squeeze %65 : memref<1x128x128xf32, #tpu.memory_space<any>> -> memref<128x128xf32, #tpu.memory_space<any>>
    %c0_i32_52 = arith.constant 0 : i32
    %c0_i32_53 = arith.constant 0 : i32
    %67 = tpu.memref_slice %arg5[%c0_i32_48, %c0_i32_52, %c0_i32_53] : memref<2x128x128xf32, #tpu.memory_space<vmem>> -> memref<1x128x128xf32, #tpu.memory_space<vmem>>
    %68 = tpu.memref_squeeze %67 : memref<1x128x128xf32, #tpu.memory_space<vmem>> -> memref<128x128xf32, #tpu.memory_space<vmem>>
    %69 = tpu.memref_slice %arg6[%c0_i32_49] : memref<2x!tpu.dma_semaphore, #tpu.memory_space<semaphore_mem>> -> memref<1x!tpu.dma_semaphore, #tpu.memory_space<semaphore_mem>>
    %70 = tpu.memref_squeeze %69 : memref<1x!tpu.dma_semaphore, #tpu.memory_space<semaphore_mem>> -> memref<!tpu.dma_semaphore, #tpu.memory_space<semaphore_mem>>
    tpu.wait_dma2 semaphore(%70 : memref<!tpu.dma_semaphore, #tpu.memory_space<semaphore_mem>>) src(%66 : memref<128x128xf32, #tpu.memory_space<any>>) dst(%68 : memref<128x128xf32, #tpu.memory_space<vmem>>)
    %c3_i32 = arith.constant 3 : i32
    %c1_i32_54 = arith.constant 1 : i32
    %c1_i32_55 = arith.constant 1 : i32
    %c0_i32_56 = arith.constant 0 : i32
    %c0_i32_57 = arith.constant 0 : i32
    %71 = tpu.memref_slice %arg2[%c3_i32, %c0_i32_56, %c0_i32_57] : memref<6x128x128xf32, #tpu.memory_space<any>> -> memref<1x128x128xf32, #tpu.memory_space<any>>
    %72 = tpu.memref_squeeze %71 : memref<1x128x128xf32, #tpu.memory_space<any>> -> memref<128x128xf32, #tpu.memory_space<any>>
    %c0_i32_58 = arith.constant 0 : i32
    %c0_i32_59 = arith.constant 0 : i32
    %73 = tpu.memref_slice %arg5[%c1_i32_54, %c0_i32_58, %c0_i32_59] : memref<2x128x128xf32, #tpu.memory_space<vmem>> -> memref<1x128x128xf32, #tpu.memory_space<vmem>>
    %74 = tpu.memref_squeeze %73 : memref<1x128x128xf32, #tpu.memory_space<vmem>> -> memref<128x128xf32, #tpu.memory_space<vmem>>
    %75 = tpu.memref_slice %arg6[%c1_i32_55] : memref<2x!tpu.dma_semaphore, #tpu.memory_space<semaphore_mem>> -> memref<1x!tpu.dma_semaphore, #tpu.memory_space<semaphore_mem>>
    %76 = tpu.memref_squeeze %75 : memref<1x!tpu.dma_semaphore, #tpu.memory_space<semaphore_mem>> -> memref<!tpu.dma_semaphore, #tpu.memory_space<semaphore_mem>>
    tpu.enqueue_dma source(%72 : memref<128x128xf32, #tpu.memory_space<any>>) target(%74 : memref<128x128xf32, #tpu.memory_space<vmem>>) target_semaphore(%76 : memref<!tpu.dma_semaphore, #tpu.memory_space<semaphore_mem>>)
    %c0_60 = arith.constant 0 : index
    %c0_61 = arith.constant 0 : index
    %c0_62 = arith.constant 0 : index
    %77 = vector.load %arg5[%c0_60, %c0_61, %c0_62] : memref<2x128x128xf32, #tpu.memory_space<vmem>>, vector<1x128x128xf32>
    %78 = vector.shape_cast %77 : vector<1x128x128xf32> to vector<128x128xf32>
    %cst_63 = arith.constant dense<0.000000e+00> : vector<8x128xf32>
    %79 = tpu.matmul %52, %78, %cst_63 {dimension_numbers = #tpu.dot_dimension_numbers<[1], [0], [0], [1], [0, 0, 1, 1], [], []>} : vector<8x128xf32>, vector<128x128xf32>, vector<8x128xf32> -> vector<8x128xf32>
    %cst_64 = arith.constant 0.000000e+00 : f32
    %80 = vector.broadcast %cst_64 : f32 to vector<8x128xf32>
    %81 = arith.maximumf %79, %80 : vector<8x128xf32>
    %82 = vector.shape_cast %81 : vector<8x128xf32> to vector<1x8x128xf32>
    %cst_65 = arith.constant dense<0.000000e+00> : vector<1xf32>
    %83 = vector.multi_reduction <add>, %82, %cst_65 [1, 2] : vector<1x8x128xf32> to vector<1xf32>
    %84 = vector.shape_cast %83 : vector<1xf32> to vector<1x1x1xf32>
    %85 = vector.extract %84[0, 0, 0] : f32 from vector<1x1x1xf32>
    %cst_66 = arith.constant 9.765625E-4 : f32
    %86 = arith.mulf %85, %cst_66 : f32
    %87 = vector.broadcast %86 : f32 to vector<8x128xf32>
    %88 = arith.subf %81, %87 : vector<8x128xf32>
    %89 = arith.mulf %88, %88 : vector<8x128xf32>
    %90 = vector.shape_cast %89 : vector<8x128xf32> to vector<1x8x128xf32>
    %cst_67 = arith.constant dense<0.000000e+00> : vector<1xf32>
    %91 = vector.multi_reduction <add>, %90, %cst_67 [1, 2] : vector<1x8x128xf32> to vector<1xf32>
    %92 = vector.shape_cast %91 : vector<1xf32> to vector<1x1x1xf32>
    %93 = vector.extract %92[0, 0, 0] : f32 from vector<1x1x1xf32>
    %c3_i32_68 = arith.constant 3 : i32
    %c1_i32_69 = arith.constant 1 : i32
    %c1_i32_70 = arith.constant 1 : i32
    %c0_i32_71 = arith.constant 0 : i32
    %c0_i32_72 = arith.constant 0 : i32
    %94 = tpu.memref_slice %arg2[%c3_i32_68, %c0_i32_71, %c0_i32_72] : memref<6x128x128xf32, #tpu.memory_space<any>> -> memref<1x128x128xf32, #tpu.memory_space<any>>
    %95 = tpu.memref_squeeze %94 : memref<1x128x128xf32, #tpu.memory_space<any>> -> memref<128x128xf32, #tpu.memory_space<any>>
    %c0_i32_73 = arith.constant 0 : i32
    %c0_i32_74 = arith.constant 0 : i32
    %96 = tpu.memref_slice %arg5[%c1_i32_69, %c0_i32_73, %c0_i32_74] : memref<2x128x128xf32, #tpu.memory_space<vmem>> -> memref<1x128x128xf32, #tpu.memory_space<vmem>>
    %97 = tpu.memref_squeeze %96 : memref<1x128x128xf32, #tpu.memory_space<vmem>> -> memref<128x128xf32, #tpu.memory_space<vmem>>
    %98 = tpu.memref_slice %arg6[%c1_i32_70] : memref<2x!tpu.dma_semaphore, #tpu.memory_space<semaphore_mem>> -> memref<1x!tpu.dma_semaphore, #tpu.memory_space<semaphore_mem>>
    %99 = tpu.memref_squeeze %98 : memref<1x!tpu.dma_semaphore, #tpu.memory_space<semaphore_mem>> -> memref<!tpu.dma_semaphore, #tpu.memory_space<semaphore_mem>>
    tpu.wait_dma2 semaphore(%99 : memref<!tpu.dma_semaphore, #tpu.memory_space<semaphore_mem>>) src(%95 : memref<128x128xf32, #tpu.memory_space<any>>) dst(%97 : memref<128x128xf32, #tpu.memory_space<vmem>>)
    %c4_i32 = arith.constant 4 : i32
    %c0_i32_75 = arith.constant 0 : i32
    %c0_i32_76 = arith.constant 0 : i32
    %c0_i32_77 = arith.constant 0 : i32
    %c0_i32_78 = arith.constant 0 : i32
    %100 = tpu.memref_slice %arg2[%c4_i32, %c0_i32_77, %c0_i32_78] : memref<6x128x128xf32, #tpu.memory_space<any>> -> memref<1x128x128xf32, #tpu.memory_space<any>>
    %101 = tpu.memref_squeeze %100 : memref<1x128x128xf32, #tpu.memory_space<any>> -> memref<128x128xf32, #tpu.memory_space<any>>
    %c0_i32_79 = arith.constant 0 : i32
    %c0_i32_80 = arith.constant 0 : i32
    %102 = tpu.memref_slice %arg5[%c0_i32_75, %c0_i32_79, %c0_i32_80] : memref<2x128x128xf32, #tpu.memory_space<vmem>> -> memref<1x128x128xf32, #tpu.memory_space<vmem>>
    %103 = tpu.memref_squeeze %102 : memref<1x128x128xf32, #tpu.memory_space<vmem>> -> memref<128x128xf32, #tpu.memory_space<vmem>>
    %104 = tpu.memref_slice %arg6[%c0_i32_76] : memref<2x!tpu.dma_semaphore, #tpu.memory_space<semaphore_mem>> -> memref<1x!tpu.dma_semaphore, #tpu.memory_space<semaphore_mem>>
    %105 = tpu.memref_squeeze %104 : memref<1x!tpu.dma_semaphore, #tpu.memory_space<semaphore_mem>> -> memref<!tpu.dma_semaphore, #tpu.memory_space<semaphore_mem>>
    tpu.enqueue_dma source(%101 : memref<128x128xf32, #tpu.memory_space<any>>) target(%103 : memref<128x128xf32, #tpu.memory_space<vmem>>) target_semaphore(%105 : memref<!tpu.dma_semaphore, #tpu.memory_space<semaphore_mem>>)
    %c1_81 = arith.constant 1 : index
    %c0_82 = arith.constant 0 : index
    %c0_83 = arith.constant 0 : index
    %106 = vector.load %arg5[%c1_81, %c0_82, %c0_83] : memref<2x128x128xf32, #tpu.memory_space<vmem>>, vector<1x128x128xf32>
    %107 = vector.shape_cast %106 : vector<1x128x128xf32> to vector<128x128xf32>
    %cst_84 = arith.constant dense<0.000000e+00> : vector<8x128xf32>
    %108 = tpu.matmul %81, %107, %cst_84 {dimension_numbers = #tpu.dot_dimension_numbers<[1], [0], [0], [1], [0, 0, 1, 1], [], []>} : vector<8x128xf32>, vector<128x128xf32>, vector<8x128xf32> -> vector<8x128xf32>
    %cst_85 = arith.constant 0.000000e+00 : f32
    %109 = vector.broadcast %cst_85 : f32 to vector<8x128xf32>
    %110 = arith.maximumf %108, %109 : vector<8x128xf32>
    %111 = vector.shape_cast %110 : vector<8x128xf32> to vector<1x8x128xf32>
    %cst_86 = arith.constant dense<0.000000e+00> : vector<1xf32>
    %112 = vector.multi_reduction <add>, %111, %cst_86 [1, 2] : vector<1x8x128xf32> to vector<1xf32>
    %113 = vector.shape_cast %112 : vector<1xf32> to vector<1x1x1xf32>
    %114 = vector.extract %113[0, 0, 0] : f32 from vector<1x1x1xf32>
    %cst_87 = arith.constant 9.765625E-4 : f32
    %115 = arith.mulf %114, %cst_87 : f32
    %116 = vector.broadcast %115 : f32 to vector<8x128xf32>
    %117 = arith.subf %110, %116 : vector<8x128xf32>
    %118 = arith.mulf %117, %117 : vector<8x128xf32>
    %119 = vector.shape_cast %118 : vector<8x128xf32> to vector<1x8x128xf32>
    %cst_88 = arith.constant dense<0.000000e+00> : vector<1xf32>
    %120 = vector.multi_reduction <add>, %119, %cst_88 [1, 2] : vector<1x8x128xf32> to vector<1xf32>
    %121 = vector.shape_cast %120 : vector<1xf32> to vector<1x1x1xf32>
    %122 = vector.extract %121[0, 0, 0] : f32 from vector<1x1x1xf32>
    %c4_i32_89 = arith.constant 4 : i32
    %c0_i32_90 = arith.constant 0 : i32
    %c0_i32_91 = arith.constant 0 : i32
    %c0_i32_92 = arith.constant 0 : i32
    %c0_i32_93 = arith.constant 0 : i32
    %123 = tpu.memref_slice %arg2[%c4_i32_89, %c0_i32_92, %c0_i32_93] : memref<6x128x128xf32, #tpu.memory_space<any>> -> memref<1x128x128xf32, #tpu.memory_space<any>>
    %124 = tpu.memref_squeeze %123 : memref<1x128x128xf32, #tpu.memory_space<any>> -> memref<128x128xf32, #tpu.memory_space<any>>
    %c0_i32_94 = arith.constant 0 : i32
    %c0_i32_95 = arith.constant 0 : i32
    %125 = tpu.memref_slice %arg5[%c0_i32_90, %c0_i32_94, %c0_i32_95] : memref<2x128x128xf32, #tpu.memory_space<vmem>> -> memref<1x128x128xf32, #tpu.memory_space<vmem>>
    %126 = tpu.memref_squeeze %125 : memref<1x128x128xf32, #tpu.memory_space<vmem>> -> memref<128x128xf32, #tpu.memory_space<vmem>>
    %127 = tpu.memref_slice %arg6[%c0_i32_91] : memref<2x!tpu.dma_semaphore, #tpu.memory_space<semaphore_mem>> -> memref<1x!tpu.dma_semaphore, #tpu.memory_space<semaphore_mem>>
    %128 = tpu.memref_squeeze %127 : memref<1x!tpu.dma_semaphore, #tpu.memory_space<semaphore_mem>> -> memref<!tpu.dma_semaphore, #tpu.memory_space<semaphore_mem>>
    tpu.wait_dma2 semaphore(%128 : memref<!tpu.dma_semaphore, #tpu.memory_space<semaphore_mem>>) src(%124 : memref<128x128xf32, #tpu.memory_space<any>>) dst(%126 : memref<128x128xf32, #tpu.memory_space<vmem>>)
    %c5_i32 = arith.constant 5 : i32
    %c1_i32_96 = arith.constant 1 : i32
    %c1_i32_97 = arith.constant 1 : i32
    %c0_i32_98 = arith.constant 0 : i32
    %c0_i32_99 = arith.constant 0 : i32
    %129 = tpu.memref_slice %arg2[%c5_i32, %c0_i32_98, %c0_i32_99] : memref<6x128x128xf32, #tpu.memory_space<any>> -> memref<1x128x128xf32, #tpu.memory_space<any>>
    %130 = tpu.memref_squeeze %129 : memref<1x128x128xf32, #tpu.memory_space<any>> -> memref<128x128xf32, #tpu.memory_space<any>>
    %c0_i32_100 = arith.constant 0 : i32
    %c0_i32_101 = arith.constant 0 : i32
    %131 = tpu.memref_slice %arg5[%c1_i32_96, %c0_i32_100, %c0_i32_101] : memref<2x128x128xf32, #tpu.memory_space<vmem>> -> memref<1x128x128xf32, #tpu.memory_space<vmem>>
    %132 = tpu.memref_squeeze %131 : memref<1x128x128xf32, #tpu.memory_space<vmem>> -> memref<128x128xf32, #tpu.memory_space<vmem>>
    %133 = tpu.memref_slice %arg6[%c1_i32_97] : memref<2x!tpu.dma_semaphore, #tpu.memory_space<semaphore_mem>> -> memref<1x!tpu.dma_semaphore, #tpu.memory_space<semaphore_mem>>
    %134 = tpu.memref_squeeze %133 : memref<1x!tpu.dma_semaphore, #tpu.memory_space<semaphore_mem>> -> memref<!tpu.dma_semaphore, #tpu.memory_space<semaphore_mem>>
    tpu.enqueue_dma source(%130 : memref<128x128xf32, #tpu.memory_space<any>>) target(%132 : memref<128x128xf32, #tpu.memory_space<vmem>>) target_semaphore(%134 : memref<!tpu.dma_semaphore, #tpu.memory_space<semaphore_mem>>)
    %c0_102 = arith.constant 0 : index
    %c0_103 = arith.constant 0 : index
    %c0_104 = arith.constant 0 : index
    %135 = vector.load %arg5[%c0_102, %c0_103, %c0_104] : memref<2x128x128xf32, #tpu.memory_space<vmem>>, vector<1x128x128xf32>
    %136 = vector.shape_cast %135 : vector<1x128x128xf32> to vector<128x128xf32>
    %cst_105 = arith.constant dense<0.000000e+00> : vector<8x128xf32>
    %137 = tpu.matmul %110, %136, %cst_105 {dimension_numbers = #tpu.dot_dimension_numbers<[1], [0], [0], [1], [0, 0, 1, 1], [], []>} : vector<8x128xf32>, vector<128x128xf32>, vector<8x128xf32> -> vector<8x128xf32>
    %cst_106 = arith.constant 0.000000e+00 : f32
    %138 = vector.broadcast %cst_106 : f32 to vector<8x128xf32>
    %139 = arith.maximumf %137, %138 : vector<8x128xf32>
    %140 = vector.shape_cast %139 : vector<8x128xf32> to vector<1x8x128xf32>
    %cst_107 = arith.constant dense<0.000000e+00> : vector<1xf32>
    %141 = vector.multi_reduction <add>, %140, %cst_107 [1, 2] : vector<1x8x128xf32> to vector<1xf32>
    %142 = vector.shape_cast %141 : vector<1xf32> to vector<1x1x1xf32>
    %143 = vector.extract %142[0, 0, 0] : f32 from vector<1x1x1xf32>
    %cst_108 = arith.constant 9.765625E-4 : f32
    %144 = arith.mulf %143, %cst_108 : f32
    %145 = vector.broadcast %144 : f32 to vector<8x128xf32>
    %146 = arith.subf %139, %145 : vector<8x128xf32>
    %147 = arith.mulf %146, %146 : vector<8x128xf32>
    %148 = vector.shape_cast %147 : vector<8x128xf32> to vector<1x8x128xf32>
    %cst_109 = arith.constant dense<0.000000e+00> : vector<1xf32>
    %149 = vector.multi_reduction <add>, %148, %cst_109 [1, 2] : vector<1x8x128xf32> to vector<1xf32>
    %150 = vector.shape_cast %149 : vector<1xf32> to vector<1x1x1xf32>
    %151 = vector.extract %150[0, 0, 0] : f32 from vector<1x1x1xf32>
    %c5_i32_110 = arith.constant 5 : i32
    %c1_i32_111 = arith.constant 1 : i32
    %c1_i32_112 = arith.constant 1 : i32
    %c0_i32_113 = arith.constant 0 : i32
    %c0_i32_114 = arith.constant 0 : i32
    %152 = tpu.memref_slice %arg2[%c5_i32_110, %c0_i32_113, %c0_i32_114] : memref<6x128x128xf32, #tpu.memory_space<any>> -> memref<1x128x128xf32, #tpu.memory_space<any>>
    %153 = tpu.memref_squeeze %152 : memref<1x128x128xf32, #tpu.memory_space<any>> -> memref<128x128xf32, #tpu.memory_space<any>>
    %c0_i32_115 = arith.constant 0 : i32
    %c0_i32_116 = arith.constant 0 : i32
    %154 = tpu.memref_slice %arg5[%c1_i32_111, %c0_i32_115, %c0_i32_116] : memref<2x128x128xf32, #tpu.memory_space<vmem>> -> memref<1x128x128xf32, #tpu.memory_space<vmem>>
    %155 = tpu.memref_squeeze %154 : memref<1x128x128xf32, #tpu.memory_space<vmem>> -> memref<128x128xf32, #tpu.memory_space<vmem>>
    %156 = tpu.memref_slice %arg6[%c1_i32_112] : memref<2x!tpu.dma_semaphore, #tpu.memory_space<semaphore_mem>> -> memref<1x!tpu.dma_semaphore, #tpu.memory_space<semaphore_mem>>
    %157 = tpu.memref_squeeze %156 : memref<1x!tpu.dma_semaphore, #tpu.memory_space<semaphore_mem>> -> memref<!tpu.dma_semaphore, #tpu.memory_space<semaphore_mem>>
    tpu.wait_dma2 semaphore(%157 : memref<!tpu.dma_semaphore, #tpu.memory_space<semaphore_mem>>) src(%153 : memref<128x128xf32, #tpu.memory_space<any>>) dst(%155 : memref<128x128xf32, #tpu.memory_space<vmem>>)
    %c1_117 = arith.constant 1 : index
    %c0_118 = arith.constant 0 : index
    %c0_119 = arith.constant 0 : index
    %158 = vector.load %arg5[%c1_117, %c0_118, %c0_119] : memref<2x128x128xf32, #tpu.memory_space<vmem>>, vector<1x128x128xf32>
    %159 = vector.shape_cast %158 : vector<1x128x128xf32> to vector<128x128xf32>
    %cst_120 = arith.constant dense<0.000000e+00> : vector<8x128xf32>
    %160 = tpu.matmul %139, %159, %cst_120 {dimension_numbers = #tpu.dot_dimension_numbers<[1], [0], [0], [1], [0, 0, 1, 1], [], []>} : vector<8x128xf32>, vector<128x128xf32>, vector<8x128xf32> -> vector<8x128xf32>
    %cst_121 = arith.constant 0.000000e+00 : f32
    %161 = vector.broadcast %cst_121 : f32 to vector<8x128xf32>
    %162 = arith.maximumf %160, %161 : vector<8x128xf32>
    %163 = vector.shape_cast %162 : vector<8x128xf32> to vector<1x8x128xf32>
    %cst_122 = arith.constant dense<0.000000e+00> : vector<1xf32>
    %164 = vector.multi_reduction <add>, %163, %cst_122 [1, 2] : vector<1x8x128xf32> to vector<1xf32>
    %165 = vector.shape_cast %164 : vector<1xf32> to vector<1x1x1xf32>
    %166 = vector.extract %165[0, 0, 0] : f32 from vector<1x1x1xf32>
    %cst_123 = arith.constant 9.765625E-4 : f32
    %167 = arith.mulf %166, %cst_123 : f32
    %168 = vector.broadcast %167 : f32 to vector<8x128xf32>
    %169 = arith.subf %162, %168 : vector<8x128xf32>
    %170 = arith.mulf %169, %169 : vector<8x128xf32>
    %171 = vector.shape_cast %170 : vector<8x128xf32> to vector<1x8x128xf32>
    %cst_124 = arith.constant dense<0.000000e+00> : vector<1xf32>
    %172 = vector.multi_reduction <add>, %171, %cst_124 [1, 2] : vector<1x8x128xf32> to vector<1xf32>
    %173 = vector.shape_cast %172 : vector<1xf32> to vector<1x1x1xf32>
    %174 = vector.extract %173[0, 0, 0] : f32 from vector<1x1x1xf32>
    %175 = tpu.iota {dimensions = array<i32: 1>} : vector<1x6xi32>
    %cst_125 = arith.constant 0.000000e+00 : f32
    %176 = vector.broadcast %cst_125 : f32 to vector<1x6xf32>
    %c0_i32_126 = arith.constant 0 : i32
    %177 = vector.broadcast %c0_i32_126 : i32 to vector<1x6xi32>
    %178 = arith.cmpi eq, %175, %177 : vector<1x6xi32>
    %179 = vector.broadcast %35 : f32 to vector<1x6xf32>
    %180 = arith.select %178, %179, %176 : vector<1x6xi1>, vector<1x6xf32>
    %c1_i32_127 = arith.constant 1 : i32
    %181 = vector.broadcast %c1_i32_127 : i32 to vector<1x6xi32>
    %182 = arith.cmpi eq, %175, %181 : vector<1x6xi32>
    %183 = vector.broadcast %64 : f32 to vector<1x6xf32>
    %184 = arith.select %182, %183, %180 : vector<1x6xi1>, vector<1x6xf32>
    %c2_i32_128 = arith.constant 2 : i32
    %185 = vector.broadcast %c2_i32_128 : i32 to vector<1x6xi32>
    %186 = arith.cmpi eq, %175, %185 : vector<1x6xi32>
    %187 = vector.broadcast %93 : f32 to vector<1x6xf32>
    %188 = arith.select %186, %187, %184 : vector<1x6xi1>, vector<1x6xf32>
    %c3_i32_129 = arith.constant 3 : i32
    %189 = vector.broadcast %c3_i32_129 : i32 to vector<1x6xi32>
    %190 = arith.cmpi eq, %175, %189 : vector<1x6xi32>
    %191 = vector.broadcast %122 : f32 to vector<1x6xf32>
    %192 = arith.select %190, %191, %188 : vector<1x6xi1>, vector<1x6xf32>
    %c4_i32_130 = arith.constant 4 : i32
    %193 = vector.broadcast %c4_i32_130 : i32 to vector<1x6xi32>
    %194 = arith.cmpi eq, %175, %193 : vector<1x6xi32>
    %195 = vector.broadcast %151 : f32 to vector<1x6xf32>
    %196 = arith.select %194, %195, %192 : vector<1x6xi1>, vector<1x6xf32>
    %c5_i32_131 = arith.constant 5 : i32
    %197 = vector.broadcast %c5_i32_131 : i32 to vector<1x6xi32>
    %198 = arith.cmpi eq, %175, %197 : vector<1x6xi32>
    %199 = vector.broadcast %174 : f32 to vector<1x6xf32>
    %200 = arith.select %198, %199, %196 : vector<1x6xi1>, vector<1x6xf32>
    %cst_132 = arith.constant 9.77517105E-4 : f32
    %201 = vector.broadcast %cst_132 : f32 to vector<1x6xf32>
    %202 = arith.mulf %200, %201 : vector<1x6xf32>
    %203 = math.sqrt %202 : vector<1x6xf32>
    %c0_133 = arith.constant 0 : index
    %c0_134 = arith.constant 0 : index
    %204 = vector.load %arg4[%c0_133, %c0_134] : memref<1x6xf32, #tpu.memory_space<vmem>>, vector<1x6xf32>
    tpu.vector_store %arg4[%c0_133, %c0_134], %203 {strides = array<i32>} : memref<1x6xf32, #tpu.memory_space<vmem>>, vector<1x6xf32>,
    %c0_135 = arith.constant 0 : index
    %c0_136 = arith.constant 0 : index
    %205 = vector.load %arg3[%c0_135, %c0_136] : memref<8x128xf32, #tpu.memory_space<vmem>>, vector<8x128xf32>
    tpu.vector_store %arg3[%c0_135, %c0_136], %162 {strides = array<i32>} : memref<8x128xf32, #tpu.memory_space<vmem>>, vector<8x128xf32>,
    return
  }
  func.func @transform_0(%arg0: i32) -> (i32, i32) {
    %c0_i32 = arith.constant 0 : i32
    %c0_i32_0 = arith.constant 0 : i32
    %c0_i32_1 = arith.constant 0 : i32
    return %c0_i32, %c0_i32_0 : i32, i32
  }
  func.func @transform_2(%arg0: i32) -> (i32, i32) {
    %c0_i32 = arith.constant 0 : i32
    %c0_i32_0 = arith.constant 0 : i32
    %c0_i32_1 = arith.constant 0 : i32
    return %c0_i32, %c0_i32_0 : i32, i32
  }
  func.func @transform_3(%arg0: i32) -> (i32, i32) {
    %c0_i32 = arith.constant 0 : i32
    %c0_i32_0 = arith.constant 0 : i32
    %c0_i32_1 = arith.constant 0 : i32
    return %c0_i32, %c0_i32_0 : i32, i32
  }
}

</mosaic_0001>

<bundles_post_ra>
// kernel: mlp_forward.1
= control target key start
LH: loop header
LB: loop body
LE: loop exit
PB: predicated region body
PF: predicated region fallthrough
CT: control target
= control target key end

     0   :  { %9 = vsyncpa [#allocation5], 0  ;;  %s1643_s0 = inlined_call_operand.hbm [shape: f32[8,128], index: 0, kind: input, shape index: {}]   ;;  %s1644_s1 = inlined_call_operand.hbm [shape: f32[6,128,128], index: 1, kind: input, shape index: {}]   ;;  %s1645_s2 = inlined_call_operand.hbm [shape: f32[8,128], index: 2, kind: output, shape index: {0}]   ;;  %s1646_s3 = inlined_call_operand.hbm [shape: f32[1,6], index: 3, kind: output, shape index: {1}]  }
   0x1   :  { %10 = vsyncpa [#allocation6], 0 }
   0x2   :  { %11 = vsyncpa [#allocation9], 0  ;;  %s1399_s12 = smov [#allocation4]  }
   0x3   :  { %s18_s13 = sshll.u32 %s1399_s12, 4  ;;  %s19_s13 = int_to_ptr.vmem [resolvable:$true] %s18_s13 }
   0x4   :  { %s1194_s14 = scalar_lea.vmem %s19_s13, 128  ;;  %p1199_p1 = scmp.lt.s32.totalorder %s19_s13, %s19_s13 }
   0x5   :  { %p1195_p0 = scmp.ne.s32.totalorder %s19_s13, %s1194_s14  ;;  %p1200_p2 = scmp.lt.s32.totalorder %s1194_s14, %s1194_s14 }
   0x7   :  { %p1201_p3 = por %p1200_p2, %p1199_p1 }
   0x9   :  { %p1202_p4 = pnand %p1201_p3, %p1195_p0 }
   0xb   :  { %1205 = shalt.err (!%p1202_p4)
}
   0xc   :  { %21 = dma.hbm_to_vmem [thread:$0]  %s1643_s0, 128, %s19_s13, [#allocation5]  }
   0xd   :  { %1381 = dma.done.wait [#allocation5], 128  }
   0xe   :  { %1382 = vsyncadd [#allocation5], 4294967168  ;;  %s1400_s17 = smov [#allocation2]  }
   0xf   :  { %s33_s18 = sshll.u32 %s1400_s17, 4  ;;  %s1429_s18 = int_to_ptr.vmem [resolvable:$true] %s33_s18 }
  0x10   :  { %s1214_s19 = scalar_lea.vmem %s1429_s18, 2048  ;;  %s1218_s20 = scalar_lea.vmem %s1429_s18, 4096 }
  0x11   :  { %p1215_p5 = scmp.ne.s32.totalorder %s1429_s18, %s1214_s19  ;;  %p1219_p6 = scmp.lt.s32.totalorder %s1429_s18, %s1429_s18 }
  0x12   :  { %p1220_p7 = scmp.lt.s32.totalorder %s1218_s20, %s1214_s19 }
  0x14   :  { %p1221_p8 = por %p1220_p7, %p1219_p6 }
  0x16   :  { %p1436_p9 = pnand %p1221_p8, %p1215_p5 }
  0x18   :  { %1225 = shalt.err (!%p1436_p9)  }
  0x19   :  { %36 = dma.hbm_to_vmem [thread:$0]  %s1644_s1, 2048, %s1429_s18, [#allocation3]  ;;  %v1446_v0 = vld [vmem:[#allocation4] sm:$0xff] }
  0x1a   :  { %1383 = dma.done.wait [#allocation3], 2048 }
  0x1b   :  { %1384 = vsyncadd [#allocation3], 4294965248  ;;  %s40_s25 = scalar_lea.hbm %s1644_s1, 2048  ;;  %s1401_s26 = smov [#allocation2 + $0x80]   ;;  %v1402_v1 = vmov 0.0   ;;  %vm1403_vm0 = vmmov 0  }
  0x1c   :  { %s50_s27 = sshll.u32 %s1401_s26, 4  ;;  %943 = vmatprep.subr.mxu0 %v1402_v1  ;;  %975 = vmatprep.mubr.msk.f32.mxu0 %vm1403_vm0, %v1402_v1  ;;  %s1454_s27 = int_to_ptr.vmem [resolvable:$true] %s50_s27 }
  0x1d   :  { %s1236_s28 = scalar_lea.vmem %s1454_s27, 2048  ;;  %p1241_p11 = scmp.lt.s32.totalorder %s1454_s27, %s1429_s18 }
  0x1e   :  { %p1237_p10 = scmp.ne.s32.totalorder %s1454_s27, %s1236_s28  ;;  %p1242_p12 = scmp.lt.s32.totalorder %s1218_s20, %s1236_s28 }
  0x20   :  { %p1243_p13 = por %p1242_p12, %p1241_p11 }
  0x22   :  { %p1460_p0 = pnand %p1243_p13, %p1237_p10 }
  0x24   :  { %1247 = shalt.err (!%p1460_p0)  }
  0x25   :  { %53 = dma.hbm_to_vmem [thread:$0]  %s40_s25, 2048, %s1454_s27, [#allocation3 + $0x1] }
  0x26   :  { %v69_v2 = vld [vmem:[#allocation2 + $0x78] sm:$0xff]  ;;  %v68_v3 = vld [vmem:[#allocation2 + $0x70] sm:$0xff]  ;;  %v67_v4 = vld [vmem:[#allocation2 + $0x68] sm:$0xff] }
  0x27   :  { %944 = vmatpush3.msra.mxu0 %v69_v2  ;;  %v66_v5 = vld [vmem:[#allocation2 + $0x60] sm:$0xff]  ;;  %v65_v6 = vld [vmem:[#allocation2 + $0x58] sm:$0xff]  ;;  %v64_v7 = vld [vmem:[#allocation2 + $0x50] sm:$0xff] }
  0x28   :  { %945 = vmatprep.subr.mxu0 %v1402_v1  ;;  %v63_v8 = vld [vmem:[#allocation2 + $0x48] sm:$0xff]  ;;  %v62_v9 = vld [vmem:[#allocation2 + $0x40] sm:$0xff]  ;;  %v61_v10 = vld [vmem:[#allocation2 + $0x38] sm:$0xff] }
  0x29   :  { %946 = vmatpush3.msra.mxu0 %v68_v3  ;;  %v60_v11 = vld [vmem:[#allocation2 + $0x30] sm:$0xff]  ;;  %v59_v12 = vld [vmem:[#allocation2 + $0x28] sm:$0xff]  ;;  %v58_v13 = vld [vmem:[#allocation2 + $0x20] sm:$0xff] }
  0x2a   :  { %947 = vmatprep.subr.mxu0 %v1402_v1  ;;  %v57_v14 = vld [vmem:[#allocation2 + $0x18] sm:$0xff]  ;;  %v56_v15 = vld [vmem:[#allocation2 + $0x10] sm:$0xff]  ;;  %v55_v16 = vld [vmem:[#allocation2 + $0x8] sm:$0xff] }
  0x2b   :  { %948 = vmatpush3.msra.mxu0 %v67_v4  ;;  %v54_v17 = vld [vmem:[#allocation2] sm:$0xff] }
  0x2c   :  { %949 = vmatprep.subr.mxu0 %v1402_v1 }
  0x2d   :  { %950 = vmatpush3.msra.mxu0 %v66_v5 }
  0x2e   :  { %951 = vmatprep.subr.mxu0 %v1402_v1 }
  0x2f   :  { %952 = vmatpush3.msra.mxu0 %v65_v6 }
  0x30   :  { %953 = vmatprep.subr.mxu0 %v1402_v1 }
  0x31   :  { %954 = vmatpush3.msra.mxu0 %v64_v7 }
  0x32   :  { %955 = vmatprep.subr.mxu0 %v1402_v1 }
  0x33   :  { %956 = vmatpush3.msra.mxu0 %v63_v8 }
  0x34   :  { %957 = vmatprep.subr.mxu0 %v1402_v1 }
  0x35   :  { %958 = vmatpush3.msra.mxu0 %v62_v9 }
  0x36   :  { %959 = vmatprep.subr.mxu0 %v1402_v1 }
  0x37   :  { %960 = vmatpush3.msra.mxu0 %v61_v10 }
  0x38   :  { %961 = vmatprep.subr.mxu0 %v1402_v1 }
  0x39   :  { %962 = vmatpush3.msra.mxu0 %v60_v11 }
  0x3a   :  { %963 = vmatprep.subr.mxu0 %v1402_v1 }
  0x3b   :  { %964 = vmatpush3.msra.mxu0 %v59_v12 }
  0x3c   :  { %965 = vmatprep.subr.mxu0 %v1402_v1 }
  0x3d   :  { %966 = vmatpush3.msra.mxu0 %v58_v13 }
  0x3e   :  { %967 = vmatprep.subr.mxu0 %v1402_v1 }
  0x3f   :  { %968 = vmatpush3.msra.mxu0 %v57_v14 }
  0x40   :  { %969 = vmatprep.subr.mxu0 %v1402_v1 }
  0x41   :  { %970 = vmatpush3.msra.mxu0 %v56_v15 }
  0x42   :  { %971 = vmatprep.subr.mxu0 %v1402_v1 }
  0x43   :  { %972 = vmatpush3.msra.mxu0 %v55_v16 }
  0x44   :  { %973 = vmatprep.subr.mxu0 %v1402_v1 }
  0x45   :  { %974 = vmatpush3.msra.mxu0 %v54_v17 }
  0x46   :  { %976 = vmatmul.mubr.f32.vlgmr.msra.gmra.mxu0 %v1446_v0 }
 0x106   :  { %v136_v18 = vpop.f32.mrf.mxu0 }
 0x107   :  { %v1483_v19 = vmax.f32 %v136_v18, 0.0 }
 0x108   :  { %v977_v20 = vpop.f32.mrf.mxu0 }
 0x109   :  { %141 = vadd.xlane.f32.xlu0 %v1483_v19 }
 0x192   :  { %v142_v21 = vpop.xlane.xlu0 %141 }
 0x193   :  { %v143_v22 = vrot.slane %v142_v21, 4 }
 0x195   :  { %v144_v23 = vadd.f32 %v143_v22, %v142_v21 }
 0x197   :  { %v145_v24 = vrot.slane %v144_v23, 2 }
 0x199   :  { %v146_v25 = vadd.f32 %v145_v24, %v144_v23 }
 0x19b   :  { %v147_v26 = vrot.slane %v146_v25, 1 }
 0x19d   :  { %v148_v27 = vadd.f32 %v147_v26, %v146_v25 }
 0x19f   :  { %1153 = vpush %v148_v27 }
 0x1d0   :  { %s1154_s30 = spop %1153 }
 0x1d1   :  { %s150_s4 = smul.f32 0.0009765625, %s1154_s30 }
 0x1d3   :  { %v151_v28 = vstv %s150_s4 }
 0x1d4   :  { %v152_v29 = vsub.f32 %v1483_v19, %v151_v28 }
 0x1d6   :  { %v153_v30 = vmul.f32 %v152_v29, %v152_v29 }
 0x1d8   :  { %154 = vadd.xlane.f32.xlu0 %v153_v30 }
 0x261   :  { %v155_v31 = vpop.xlane.xlu0 %154 }
 0x262   :  { %v156_v32 = vrot.slane %v155_v31, 4 }
 0x264   :  { %v157_v33 = vadd.f32 %v156_v32, %v155_v31 }
 0x266   :  { %v158_v34 = vrot.slane %v157_v33, 2 }
 0x268   :  { %v159_v35 = vadd.f32 %v158_v34, %v157_v33 }
 0x26a   :  { %v160_v36 = vrot.slane %v159_v35, 1 }
 0x26c   :  { %v161_v37 = vadd.f32 %v160_v36, %v159_v35 }
 0x26e   :  { %1155 = vpush %v161_v37 }
 0x29f   :  { %s1487_s5 = spop %1155 }
 0x2a0   :  { %1385 = dma.done.wait [#allocation3 + $0x1], 2048 }
 0x2a1   :  { %1386 = vsyncadd [#allocation3 + $0x1], 4294965248  ;;  %s165_s8 = scalar_lea.hbm %s1644_s1, 4096  ;;  %978 = vmatprep.subr.mxu1 %v1402_v1  ;;  %1010 = vmatprep.mubr.msk.f32.mxu1 %vm1403_vm0, %v1402_v1 }
 0x2a2   :  { %1270 = shalt.err (!%p1436_p9)  }
 0x2a3   :  { %176 = dma.hbm_to_vmem [thread:$0]  %s165_s8, 2048, %s1429_s18, [#allocation3] }
 0x2a4   :  { %v192_v38 = vld [vmem:[#allocation2 + $0xf8] sm:$0xff]  ;;  %v191_v39 = vld [vmem:[#allocation2 + $0xf0] sm:$0xff]  ;;  %v190_v40 = vld [vmem:[#allocation2 + $0xe8] sm:$0xff] }
 0x2a5   :  { %979 = vmatpush3.msra.mxu1 %v192_v38  ;;  %v189_v41 = vld [vmem:[#allocation2 + $0xe0] sm:$0xff]  ;;  %v188_v42 = vld [vmem:[#allocation2 + $0xd8] sm:$0xff]  ;;  %v187_v43 = vld [vmem:[#allocation2 + $0xd0] sm:$0xff] }
 0x2a6   :  { %980 = vmatprep.subr.mxu1 %v1402_v1  ;;  %v186_v44 = vld [vmem:[#allocation2 + $0xc8] sm:$0xff]  ;;  %v185_v45 = vld [vmem:[#allocation2 + $0xc0] sm:$0xff]  ;;  %v184_v46 = vld [vmem:[#allocation2 + $0xb8] sm:$0xff] }
 0x2a7   :  { %981 = vmatpush3.msra.mxu1 %v191_v39  ;;  %v183_v47 = vld [vmem:[#allocation2 + $0xb0] sm:$0xff]  ;;  %v182_v48 = vld [vmem:[#allocation2 + $0xa8] sm:$0xff]  ;;  %v181_v49 = vld [vmem:[#allocation2 + $0xa0] sm:$0xff] }
 0x2a8   :  { %982 = vmatprep.subr.mxu1 %v1402_v1  ;;  %v180_v50 = vld [vmem:[#allocation2 + $0x98] sm:$0xff]  ;;  %v179_v51 = vld [vmem:[#allocation2 + $0x90] sm:$0xff]  ;;  %v178_v52 = vld [vmem:[#allocation2 + $0x88] sm:$0xff] }
 0x2a9   :  { %983 = vmatpush3.msra.mxu1 %v190_v40  ;;  %v177_v53 = vld [vmem:[#allocation2 + $0x80] sm:$0xff] }
 0x2aa   :  { %984 = vmatprep.subr.mxu1 %v1402_v1 }
 0x2ab   :  { %985 = vmatpush3.msra.mxu1 %v189_v41 }
 0x2ac   :  { %986 = vmatprep.subr.mxu1 %v1402_v1 }
 0x2ad   :  { %987 = vmatpush3.msra.mxu1 %v188_v42 }
 0x2ae   :  { %988 = vmatprep.subr.mxu1 %v1402_v1 }
 0x2af   :  { %989 = vmatpush3.msra.mxu1 %v187_v43 }
 0x2b0   :  { %990 = vmatprep.subr.mxu1 %v1402_v1 }
 0x2b1   :  { %991 = vmatpush3.msra.mxu1 %v186_v44 }
 0x2b2   :  { %992 = vmatprep.subr.mxu1 %v1402_v1 }
 0x2b3   :  { %993 = vmatpush3.msra.mxu1 %v185_v45 }
 0x2b4   :  { %994 = vmatprep.subr.mxu1 %v1402_v1 }
 0x2b5   :  { %995 = vmatpush3.msra.mxu1 %v184_v46 }
 0x2b6   :  { %996 = vmatprep.subr.mxu1 %v1402_v1 }
 0x2b7   :  { %997 = vmatpush3.msra.mxu1 %v183_v47 }
 0x2b8   :  { %998 = vmatprep.subr.mxu1 %v1402_v1 }
 0x2b9   :  { %999 = vmatpush3.msra.mxu1 %v182_v48 }
 0x2ba   :  { %1000 = vmatprep.subr.mxu1 %v1402_v1 }
 0x2bb   :  { %1001 = vmatpush3.msra.mxu1 %v181_v49 }
 0x2bc   :  { %1002 = vmatprep.subr.mxu1 %v1402_v1 }
 0x2bd   :  { %1003 = vmatpush3.msra.mxu1 %v180_v50 }
 0x2be   :  { %1004 = vmatprep.subr.mxu1 %v1402_v1 }
 0x2bf   :  { %1005 = vmatpush3.msra.mxu1 %v179_v51 }
 0x2c0   :  { %1006 = vmatprep.subr.mxu1 %v1402_v1 }
 0x2c1   :  { %1007 = vmatpush3.msra.mxu1 %v178_v52 }
 0x2c2   :  { %1008 = vmatprep.subr.mxu1 %v1402_v1 }
 0x2c3   :  { %1009 = vmatpush3.msra.mxu1 %v177_v53 }
 0x2c4   :  { %1011 = vmatmul.mubr.f32.vlgmr.msra.gmra.mxu1 %v1483_v19 }
 0x384   :  { %v259_v54 = vpop.f32.mrf.mxu1 }
 0x385   :  { %v1514_v55 = vmax.f32 %v259_v54, 0.0 }
 0x386   :  { %v1012_v56 = vpop.f32.mrf.mxu1 }
 0x387   :  { %264 = vadd.xlane.f32.xlu0 %v1514_v55 }
 0x410   :  { %v265_v57 = vpop.xlane.xlu0 %264 }
 0x411   :  { %v266_v58 = vrot.slane %v265_v57, 4 }
 0x413   :  { %v267_v59 = vadd.f32 %v266_v58, %v265_v57 }
 0x415   :  { %v268_v60 = vrot.slane %v267_v59, 2 }
 0x417   :  { %v269_v61 = vadd.f32 %v268_v60, %v267_v59 }
 0x419   :  { %v270_v62 = vrot.slane %v269_v61, 1 }
 0x41b   :  { %v271_v63 = vadd.f32 %v270_v62, %v269_v61 }
 0x41d   :  { %1157 = vpush %v271_v63 }
 0x44e   :  { %s1158_s9 = spop %1157 }
 0x44f   :  { %s273_s10 = smul.f32 0.0009765625, %s1158_s9 }
 0x451   :  { %v274_v0 = vstv %s273_s10 }
 0x452   :  { %v275_v2 = vsub.f32 %v1514_v55, %v274_v0 }
 0x454   :  { %v276_v3 = vmul.f32 %v275_v2, %v275_v2 }
 0x456   :  { %277 = vadd.xlane.f32.xlu0 %v276_v3 }
 0x4df   :  { %v278_v4 = vpop.xlane.xlu0 %277 }
 0x4e0   :  { %v279_v5 = vrot.slane %v278_v4, 4 }
 0x4e2   :  { %v280_v6 = vadd.f32 %v279_v5, %v278_v4 }
 0x4e4   :  { %v281_v7 = vrot.slane %v280_v6, 2 }
 0x4e6   :  { %v282_v8 = vadd.f32 %v281_v7, %v280_v6 }
 0x4e8   :  { %v283_v9 = vrot.slane %v282_v8, 1 }
 0x4ea   :  { %v284_v10 = vadd.f32 %v283_v9, %v282_v8 }
 0x4ec   :  { %1159 = vpush %v284_v10 }
 0x51d   :  { %s1518_s11 = spop %1159 }
 0x51e   :  { %1387 = dma.done.wait [#allocation3], 2048 }
 0x51f   :  { %1388 = vsyncadd [#allocation3], 4294965248  ;;  %s288_s14 = scalar_lea.hbm %s1644_s1, 6144  ;;  %1013 = vmatprep.subr.mxu0 %v1402_v1  ;;  %1045 = vmatprep.mubr.msk.f32.mxu0 %vm1403_vm0, %v1402_v1 }
 0x520   :  { %1293 = shalt.err (!%p1460_p0)  }
 0x521   :  { %299 = dma.hbm_to_vmem [thread:$0]  %s288_s14, 2048, %s1454_s27, [#allocation3 + $0x1] }
 0x522   :  { %v315_v11 = vld [vmem:[#allocation2 + $0x78] sm:$0xff]  ;;  %v314_v12 = vld [vmem:[#allocation2 + $0x70] sm:$0xff]  ;;  %v313_v13 = vld [vmem:[#allocation2 + $0x68] sm:$0xff] }
 0x523   :  { %1014 = vmatpush3.msra.mxu0 %v315_v11  ;;  %v312_v14 = vld [vmem:[#allocation2 + $0x60] sm:$0xff]  ;;  %v311_v15 = vld [vmem:[#allocation2 + $0x58] sm:$0xff]  ;;  %v310_v16 = vld [vmem:[#allocation2 + $0x50] sm:$0xff] }
 0x524   :  { %1015 = vmatprep.subr.mxu0 %v1402_v1  ;;  %v309_v17 = vld [vmem:[#allocation2 + $0x48] sm:$0xff]  ;;  %v308_v18 = vld [vmem:[#allocation2 + $0x40] sm:$0xff]  ;;  %v307_v19 = vld [vmem:[#allocation2 + $0x38] sm:$0xff] }
 0x525   :  { %1016 = vmatpush3.msra.mxu0 %v314_v12  ;;  %v306_v20 = vld [vmem:[#allocation2 + $0x30] sm:$0xff]  ;;  %v305_v21 = vld [vmem:[#allocation2 + $0x28] sm:$0xff]  ;;  %v304_v22 = vld [vmem:[#allocation2 + $0x20] sm:$0xff] }
 0x526   :  { %1017 = vmatprep.subr.mxu0 %v1402_v1  ;;  %v303_v23 = vld [vmem:[#allocation2 + $0x18] sm:$0xff]  ;;  %v302_v24 = vld [vmem:[#allocation2 + $0x10] sm:$0xff]  ;;  %v301_v25 = vld [vmem:[#allocation2 + $0x8] sm:$0xff] }
 0x527   :  { %1018 = vmatpush3.msra.mxu0 %v313_v13  ;;  %v300_v26 = vld [vmem:[#allocation2] sm:$0xff] }
 0x528   :  { %1019 = vmatprep.subr.mxu0 %v1402_v1 }
 0x529   :  { %1020 = vmatpush3.msra.mxu0 %v312_v14 }
 0x52a   :  { %1021 = vmatprep.subr.mxu0 %v1402_v1 }
 0x52b   :  { %1022 = vmatpush3.msra.mxu0 %v311_v15 }
 0x52c   :  { %1023 = vmatprep.subr.mxu0 %v1402_v1 }
 0x52d   :  { %1024 = vmatpush3.msra.mxu0 %v310_v16 }
 0x52e   :  { %1025 = vmatprep.subr.mxu0 %v1402_v1 }
 0x52f   :  { %1026 = vmatpush3.msra.mxu0 %v309_v17 }
 0x530   :  { %1027 = vmatprep.subr.mxu0 %v1402_v1 }
 0x531   :  { %1028 = vmatpush3.msra.mxu0 %v308_v18 }
 0x532   :  { %1029 = vmatprep.subr.mxu0 %v1402_v1 }
 0x533   :  { %1030 = vmatpush3.msra.mxu0 %v307_v19 }
 0x534   :  { %1031 = vmatprep.subr.mxu0 %v1402_v1 }
 0x535   :  { %1032 = vmatpush3.msra.mxu0 %v306_v20 }
 0x536   :  { %1033 = vmatprep.subr.mxu0 %v1402_v1 }
 0x537   :  { %1034 = vmatpush3.msra.mxu0 %v305_v21 }
 0x538   :  { %1035 = vmatprep.subr.mxu0 %v1402_v1 }
 0x539   :  { %1036 = vmatpush3.msra.mxu0 %v304_v22 }
 0x53a   :  { %1037 = vmatprep.subr.mxu0 %v1402_v1 }
 0x53b   :  { %1038 = vmatpush3.msra.mxu0 %v303_v23 }
 0x53c   :  { %1039 = vmatprep.subr.mxu0 %v1402_v1 }
 0x53d   :  { %1040 = vmatpush3.msra.mxu0 %v302_v24 }
 0x53e   :  { %1041 = vmatprep.subr.mxu0 %v1402_v1 }
 0x53f   :  { %1042 = vmatpush3.msra.mxu0 %v301_v25 }
 0x540   :  { %1043 = vmatprep.subr.mxu0 %v1402_v1 }
 0x541   :  { %1044 = vmatpush3.msra.mxu0 %v300_v26 }
 0x542   :  { %1046 = vmatmul.mubr.f32.vlgmr.msra.gmra.mxu0 %v1514_v55 }
 0x602   :  { %v382_v27 = vpop.f32.mrf.mxu0 }
 0x603   :  { %v1545_v28 = vmax.f32 %v382_v27, 0.0 }
 0x604   :  { %v1047_v29 = vpop.f32.mrf.mxu0 }
 0x605   :  { %387 = vadd.xlane.f32.xlu0 %v1545_v28 }
 0x68e   :  { %v388_v30 = vpop.xlane.xlu0 %387 }
 0x68f   :  { %v389_v31 = vrot.slane %v388_v30, 4 }
 0x691   :  { %v390_v32 = vadd.f32 %v389_v31, %v388_v30 }
 0x693   :  { %v391_v33 = vrot.slane %v390_v32, 2 }
 0x695   :  { %v392_v34 = vadd.f32 %v391_v33, %v390_v32 }
 0x697   :  { %v393_v35 = vrot.slane %v392_v34, 1 }
 0x699   :  { %v394_v36 = vadd.f32 %v393_v35, %v392_v34 }
 0x69b   :  { %1161 = vpush %v394_v36 }
 0x6cc   :  { %s1162_s15 = spop %1161 }
 0x6cd   :  { %s396_s16 = smul.f32 0.0009765625, %s1162_s15 }
 0x6cf   :  { %v397_v37 = vstv %s396_s16 }
 0x6d0   :  { %v398_v38 = vsub.f32 %v1545_v28, %v397_v37 }
 0x6d2   :  { %v399_v39 = vmul.f32 %v398_v38, %v398_v38 }
 0x6d4   :  { %400 = vadd.xlane.f32.xlu0 %v399_v39 }
 0x75d   :  { %v401_v40 = vpop.xlane.xlu0 %400 }
 0x75e   :  { %v402_v41 = vrot.slane %v401_v40, 4 }
 0x760   :  { %v403_v42 = vadd.f32 %v402_v41, %v401_v40 }
 0x762   :  { %v404_v43 = vrot.slane %v403_v42, 2 }
 0x764   :  { %v405_v44 = vadd.f32 %v404_v43, %v403_v42 }
 0x766   :  { %v406_v45 = vrot.slane %v405_v44, 1 }
 0x768   :  { %v407_v46 = vadd.f32 %v406_v45, %v405_v44 }
 0x76a   :  { %1163 = vpush %v407_v46 }
 0x79b   :  { %s1549_s17 = spop %1163 }
 0x79c   :  { %1389 = dma.done.wait [#allocation3 + $0x1], 2048 }
 0x79d   :  { %1390 = vsyncadd [#allocation3 + $0x1], 4294965248  ;;  %s411_s0 = scalar_lea.hbm %s1644_s1, 8192  ;;  %1048 = vmatprep.subr.mxu1 %v1402_v1  ;;  %1080 = vmatprep.mubr.msk.f32.mxu1 %vm1403_vm0, %v1402_v1 }
 0x79e   :  { %1316 = shalt.err (!%p1436_p9)  }
 0x79f   :  { %422 = dma.hbm_to_vmem [thread:$0]  %s411_s0, 2048, %s1429_s18, [#allocation3] }
 0x7a0   :  { %v438_v47 = vld [vmem:[#allocation2 + $0xf8] sm:$0xff]  ;;  %v437_v48 = vld [vmem:[#allocation2 + $0xf0] sm:$0xff]  ;;  %v436_v49 = vld [vmem:[#allocation2 + $0xe8] sm:$0xff] }
 0x7a1   :  { %1049 = vmatpush3.msra.mxu1 %v438_v47  ;;  %v435_v50 = vld [vmem:[#allocation2 + $0xe0] sm:$0xff]  ;;  %v434_v51 = vld [vmem:[#allocation2 + $0xd8] sm:$0xff]  ;;  %v433_v52 = vld [vmem:[#allocation2 + $0xd0] sm:$0xff] }
 0x7a2   :  { %1050 = vmatprep.subr.mxu1 %v1402_v1  ;;  %v432_v53 = vld [vmem:[#allocation2 + $0xc8] sm:$0xff]  ;;  %v431_v54 = vld [vmem:[#allocation2 + $0xc0] sm:$0xff]  ;;  %v430_v55 = vld [vmem:[#allocation2 + $0xb8] sm:$0xff] }
 0x7a3   :  { %1051 = vmatpush3.msra.mxu1 %v437_v48  ;;  %v429_v56 = vld [vmem:[#allocation2 + $0xb0] sm:$0xff]  ;;  %v428_v57 = vld [vmem:[#allocation2 + $0xa8] sm:$0xff]  ;;  %v427_v58 = vld [vmem:[#allocation2 + $0xa0] sm:$0xff] }
 0x7a4   :  { %1052 = vmatprep.subr.mxu1 %v1402_v1  ;;  %v426_v59 = vld [vmem:[#allocation2 + $0x98] sm:$0xff]  ;;  %v425_v60 = vld [vmem:[#allocation2 + $0x90] sm:$0xff]  ;;  %v424_v61 = vld [vmem:[#allocation2 + $0x88] sm:$0xff] }
 0x7a5   :  { %1053 = vmatpush3.msra.mxu1 %v436_v49  ;;  %v423_v62 = vld [vmem:[#allocation2 + $0x80] sm:$0xff] }
 0x7a6   :  { %1054 = vmatprep.subr.mxu1 %v1402_v1 }
 0x7a7   :  { %1055 = vmatpush3.msra.mxu1 %v435_v50 }
 0x7a8   :  { %1056 = vmatprep.subr.mxu1 %v1402_v1 }
 0x7a9   :  { %1057 = vmatpush3.msra.mxu1 %v434_v51 }
 0x7aa   :  { %1058 = vmatprep.subr.mxu1 %v1402_v1 }
 0x7ab   :  { %1059 = vmatpush3.msra.mxu1 %v433_v52 }
 0x7ac   :  { %1060 = vmatprep.subr.mxu1 %v1402_v1 }
 0x7ad   :  { %1061 = vmatpush3.msra.mxu1 %v432_v53 }
 0x7ae   :  { %1062 = vmatprep.subr.mxu1 %v1402_v1 }
 0x7af   :  { %1063 = vmatpush3.msra.mxu1 %v431_v54 }
 0x7b0   :  { %1064 = vmatprep.subr.mxu1 %v1402_v1 }
 0x7b1   :  { %1065 = vmatpush3.msra.mxu1 %v430_v55 }
 0x7b2   :  { %1066 = vmatprep.subr.mxu1 %v1402_v1 }
 0x7b3   :  { %1067 = vmatpush3.msra.mxu1 %v429_v56 }
 0x7b4   :  { %1068 = vmatprep.subr.mxu1 %v1402_v1 }
 0x7b5   :  { %1069 = vmatpush3.msra.mxu1 %v428_v57 }
 0x7b6   :  { %1070 = vmatprep.subr.mxu1 %v1402_v1 }
 0x7b7   :  { %1071 = vmatpush3.msra.mxu1 %v427_v58 }
 0x7b8   :  { %1072 = vmatprep.subr.mxu1 %v1402_v1 }
 0x7b9   :  { %1073 = vmatpush3.msra.mxu1 %v426_v59 }
 0x7ba   :  { %1074 = vmatprep.subr.mxu1 %v1402_v1 }
 0x7bb   :  { %1075 = vmatpush3.msra.mxu1 %v425_v60 }
 0x7bc   :  { %1076 = vmatprep.subr.mxu1 %v1402_v1 }
 0x7bd   :  { %1077 = vmatpush3.msra.mxu1 %v424_v61 }
 0x7be   :  { %1078 = vmatprep.subr.mxu1 %v1402_v1 }
 0x7bf   :  { %1079 = vmatpush3.msra.mxu1 %v423_v62 }
 0x7c0   :  { %1081 = vmatmul.mubr.f32.vlgmr.msra.gmra.mxu1 %v1545_v28 }
 0x880   :  { %v505_v63 = vpop.f32.mrf.mxu1 }
 0x881   :  { %v1576_v0 = vmax.f32 %v505_v63, 0.0 }
 0x882   :  { %v1082_v2 = vpop.f32.mrf.mxu1 }
 0x883   :  { %510 = vadd.xlane.f32.xlu0 %v1576_v0 }
 0x90c   :  { %v511_v3 = vpop.xlane.xlu0 %510 }
 0x90d   :  { %v512_v4 = vrot.slane %v511_v3, 4 }
 0x90f   :  { %v513_v5 = vadd.f32 %v512_v4, %v511_v3 }
 0x911   :  { %v514_v6 = vrot.slane %v513_v5, 2 }
 0x913   :  { %v515_v7 = vadd.f32 %v514_v6, %v513_v5 }
 0x915   :  { %v516_v8 = vrot.slane %v515_v7, 1 }
 0x917   :  { %v517_v9 = vadd.f32 %v516_v8, %v515_v7 }
 0x919   :  { %1165 = vpush %v517_v9 }
 0x94a   :  { %s1166_s18 = spop %1165 }
 0x94b   :  { %s519_s21 = smul.f32 0.0009765625, %s1166_s18 }
 0x94d   :  { %v520_v10 = vstv %s519_s21 }
 0x94e   :  { %v521_v11 = vsub.f32 %v1576_v0, %v520_v10 }
 0x950   :  { %v522_v12 = vmul.f32 %v521_v11, %v521_v11 }
 0x952   :  { %523 = vadd.xlane.f32.xlu0 %v522_v12 }
 0x9db   :  { %v524_v13 = vpop.xlane.xlu0 %523 }
 0x9dc   :  { %v525_v14 = vrot.slane %v524_v13, 4 }
 0x9de   :  { %v526_v15 = vadd.f32 %v525_v14, %v524_v13 }
 0x9e0   :  { %v527_v16 = vrot.slane %v526_v15, 2 }
 0x9e2   :  { %v528_v17 = vadd.f32 %v527_v16, %v526_v15 }
 0x9e4   :  { %v529_v18 = vrot.slane %v528_v17, 1 }
 0x9e6   :  { %v530_v19 = vadd.f32 %v529_v18, %v528_v17 }
 0x9e8   :  { %1167 = vpush %v530_v19 }
 0xa19   :  { %s1580_s22 = spop %1167 }
 0xa1a   :  { %1391 = dma.done.wait [#allocation3], 2048 }
 0xa1b   :  { %1392 = vsyncadd [#allocation3], 4294965248  ;;  %s534_s25 = scalar_lea.hbm %s1644_s1, 10240  ;;  %1083 = vmatprep.subr.mxu0 %v1402_v1  ;;  %1115 = vmatprep.mubr.msk.f32.mxu0 %vm1403_vm0, %v1402_v1 }
 0xa1c   :  { %1339 = shalt.err (!%p1460_p0)  }
 0xa1d   :  { %545 = dma.hbm_to_vmem [thread:$0]  %s534_s25, 2048, %s1454_s27, [#allocation3 + $0x1] }
 0xa1e   :  { %v561_v20 = vld [vmem:[#allocation2 + $0x78] sm:$0xff]  ;;  %v560_v21 = vld [vmem:[#allocation2 + $0x70] sm:$0xff]  ;;  %v559_v22 = vld [vmem:[#allocation2 + $0x68] sm:$0xff] }
 0xa1f   :  { %1084 = vmatpush3.msra.mxu0 %v561_v20  ;;  %v558_v23 = vld [vmem:[#allocation2 + $0x60] sm:$0xff]  ;;  %v557_v24 = vld [vmem:[#allocation2 + $0x58] sm:$0xff]  ;;  %v556_v25 = vld [vmem:[#allocation2 + $0x50] sm:$0xff] }
 0xa20   :  { %1085 = vmatprep.subr.mxu0 %v1402_v1  ;;  %v555_v26 = vld [vmem:[#allocation2 + $0x48] sm:$0xff]  ;;  %v554_v27 = vld [vmem:[#allocation2 + $0x40] sm:$0xff]  ;;  %v553_v28 = vld [vmem:[#allocation2 + $0x38] sm:$0xff] }
 0xa21   :  { %1086 = vmatpush3.msra.mxu0 %v560_v21  ;;  %v552_v29 = vld [vmem:[#allocation2 + $0x30] sm:$0xff]  ;;  %v551_v30 = vld [vmem:[#allocation2 + $0x28] sm:$0xff]  ;;  %v550_v31 = vld [vmem:[#allocation2 + $0x20] sm:$0xff] }
 0xa22   :  { %1087 = vmatprep.subr.mxu0 %v1402_v1  ;;  %v549_v32 = vld [vmem:[#allocation2 + $0x18] sm:$0xff]  ;;  %v548_v33 = vld [vmem:[#allocation2 + $0x10] sm:$0xff]  ;;  %v547_v34 = vld [vmem:[#allocation2 + $0x8] sm:$0xff] }
 0xa23   :  { %1088 = vmatpush3.msra.mxu0 %v559_v22  ;;  %v546_v35 = vld [vmem:[#allocation2] sm:$0xff] }
 0xa24   :  { %1089 = vmatprep.subr.mxu0 %v1402_v1 }
 0xa25   :  { %1090 = vmatpush3.msra.mxu0 %v558_v23 }
 0xa26   :  { %1091 = vmatprep.subr.mxu0 %v1402_v1 }
 0xa27   :  { %1092 = vmatpush3.msra.mxu0 %v557_v24 }
 0xa28   :  { %1093 = vmatprep.subr.mxu0 %v1402_v1 }
 0xa29   :  { %1094 = vmatpush3.msra.mxu0 %v556_v25 }
 0xa2a   :  { %1095 = vmatprep.subr.mxu0 %v1402_v1 }
 0xa2b   :  { %1096 = vmatpush3.msra.mxu0 %v555_v26 }
 0xa2c   :  { %1097 = vmatprep.subr.mxu0 %v1402_v1 }
 0xa2d   :  { %1098 = vmatpush3.msra.mxu0 %v554_v27 }
 0xa2e   :  { %1099 = vmatprep.subr.mxu0 %v1402_v1 }
 0xa2f   :  { %1100 = vmatpush3.msra.mxu0 %v553_v28 }
 0xa30   :  { %1101 = vmatprep.subr.mxu0 %v1402_v1 }
 0xa31   :  { %1102 = vmatpush3.msra.mxu0 %v552_v29 }
 0xa32   :  { %1103 = vmatprep.subr.mxu0 %v1402_v1 }
 0xa33   :  { %1104 = vmatpush3.msra.mxu0 %v551_v30 }
 0xa34   :  { %1105 = vmatprep.subr.mxu0 %v1402_v1 }
 0xa35   :  { %1106 = vmatpush3.msra.mxu0 %v550_v31 }
 0xa36   :  { %1107 = vmatprep.subr.mxu0 %v1402_v1 }
 0xa37   :  { %1108 = vmatpush3.msra.mxu0 %v549_v32 }
 0xa38   :  { %1109 = vmatprep.subr.mxu0 %v1402_v1 }
 0xa39   :  { %1110 = vmatpush3.msra.mxu0 %v548_v33 }
 0xa3a   :  { %1111 = vmatprep.subr.mxu0 %v1402_v1 }
 0xa3b   :  { %1112 = vmatpush3.msra.mxu0 %v547_v34 }
 0xa3c   :  { %1113 = vmatprep.subr.mxu0 %v1402_v1 }
 0xa3d   :  { %1114 = vmatpush3.msra.mxu0 %v546_v35 }
 0xa3e   :  { %1116 = vmatmul.mubr.f32.vlgmr.msra.gmra.mxu0 %v1576_v0 }
 0xafe   :  { %v628_v36 = vpop.f32.mrf.mxu0 }
 0xaff   :  { %v1607_v37 = vmax.f32 %v628_v36, 0.0 }
 0xb00   :  { %v1117_v38 = vpop.f32.mrf.mxu0 }
 0xb01   :  { %633 = vadd.xlane.f32.xlu0 %v1607_v37 }
 0xb8a   :  { %v634_v39 = vpop.xlane.xlu0 %633 }
 0xb8b   :  { %v635_v40 = vrot.slane %v634_v39, 4 }
 0xb8d   :  { %v636_v41 = vadd.f32 %v635_v40, %v634_v39 }
 0xb8f   :  { %v637_v42 = vrot.slane %v636_v41, 2 }
 0xb91   :  { %v638_v43 = vadd.f32 %v637_v42, %v636_v41 }
 0xb93   :  { %v639_v44 = vrot.slane %v638_v43, 1 }
 0xb95   :  { %v640_v45 = vadd.f32 %v639_v44, %v638_v43 }
 0xb97   :  { %1169 = vpush %v640_v45 }
 0xbc8   :  { %s1170_s1 = spop %1169 }
 0xbc9   :  { %s642_s26 = smul.f32 0.0009765625, %s1170_s1 }
 0xbcb   :  { %v643_v46 = vstv %s642_s26 }
 0xbcc   :  { %v644_v47 = vsub.f32 %v1607_v37, %v643_v46 }
 0xbce   :  { %v645_v48 = vmul.f32 %v644_v47, %v644_v47 }
 0xbd0   :  { %646 = vadd.xlane.f32.xlu0 %v645_v48 }
 0xc59   :  { %v647_v49 = vpop.xlane.xlu0 %646 }
 0xc5a   :  { %v648_v50 = vrot.slane %v647_v49, 4 }
 0xc5c   :  { %v649_v51 = vadd.f32 %v648_v50, %v647_v49 }
 0xc5e   :  { %v650_v52 = vrot.slane %v649_v51, 2 }
 0xc60   :  { %v651_v53 = vadd.f32 %v650_v52, %v649_v51 }
 0xc62   :  { %v652_v54 = vrot.slane %v651_v53, 1 }
 0xc64   :  { %v653_v55 = vadd.f32 %v652_v54, %v651_v53 }
 0xc66   :  { %1171 = vpush %v653_v55 }
 0xc97   :  { %s1611_s27 = spop %1171 }
 0xc98   :  { %1393 = dma.done.wait [#allocation3 + $0x1], 2048 }
 0xc99   :  { %1394 = vsyncadd [#allocation3 + $0x1], 4294965248  ;;  %1118 = vmatprep.subr.mxu1 %v1402_v1  ;;  %1150 = vmatprep.mubr.msk.f32.mxu1 %vm1403_vm0, %v1402_v1  ;;  %v672_v56 = vld [vmem:[#allocation2 + $0xf8] sm:$0xff]  ;;  %v671_v57 = vld [vmem:[#allocation2 + $0xf0] sm:$0xff]  ;;  %s1404_s30 = smov [#allocation7]  }
 0xc9a   :  { %1119 = vmatpush3.msra.mxu1 %v672_v56  ;;  %v670_v58 = vld [vmem:[#allocation2 + $0xe8] sm:$0xff]  ;;  %v669_v59 = vld [vmem:[#allocation2 + $0xe0] sm:$0xff]  ;;  %v668_v60 = vld [vmem:[#allocation2 + $0xd8] sm:$0xff]  ;;  %s803_s4 = sshll.u32 %s1404_s30, 4  ;;  %s804_s4 = int_to_ptr.vmem [resolvable:$true] %s803_s4 }
 0xc9b   :  { %1120 = vmatprep.subr.mxu1 %v1402_v1  ;;  %v667_v61 = vld [vmem:[#allocation2 + $0xd0] sm:$0xff]  ;;  %v666_v62 = vld [vmem:[#allocation2 + $0xc8] sm:$0xff]  ;;  %v665_v63 = vld [vmem:[#allocation2 + $0xc0] sm:$0xff]  ;;  %s1341_s6 = scalar_lea.vmem %s804_s4, 128  ;;  %p1346_p2 = scmp.lt.s32.totalorder %s804_s4, %s804_s4 }
 0xc9c   :  { %1121 = vmatpush3.msra.mxu1 %v671_v57  ;;  %v664_v0 = vld [vmem:[#allocation2 + $0xb8] sm:$0xff]  ;;  %v663_v2 = vld [vmem:[#allocation2 + $0xb0] sm:$0xff]  ;;  %v662_v3 = vld [vmem:[#allocation2 + $0xa8] sm:$0xff]  ;;  %p1342_p1 = scmp.ne.s32.totalorder %s804_s4, %s1341_s6  ;;  %p1347_p3 = scmp.lt.s32.totalorder %s1341_s6, %s1341_s6 }
 0xc9d   :  { %1122 = vmatprep.subr.mxu1 %v1402_v1  ;;  %v661_v4 = vld [vmem:[#allocation2 + $0xa0] sm:$0xff]  ;;  %v660_v5 = vld [vmem:[#allocation2 + $0x98] sm:$0xff]  ;;  %v659_v6 = vld [vmem:[#allocation2 + $0x90] sm:$0xff] }
 0xc9e   :  { %1123 = vmatpush3.msra.mxu1 %v670_v58  ;;  %v658_v7 = vld [vmem:[#allocation2 + $0x88] sm:$0xff]  ;;  %v657_v8 = vld [vmem:[#allocation2 + $0x80] sm:$0xff]  ;;  %p1348_p4 = por %p1347_p3, %p1346_p2 }
 0xc9f   :  { %1124 = vmatprep.subr.mxu1 %v1402_v1 }
 0xca0   :  { %1125 = vmatpush3.msra.mxu1 %v669_v59  ;;  %p1349_p5 = pnand %p1348_p4, %p1342_p1 }
 0xca1   :  { %1126 = vmatprep.subr.mxu1 %v1402_v1 }
 0xca2   :  { %1127 = vmatpush3.msra.mxu1 %v668_v60 }
 0xca3   :  { %1128 = vmatprep.subr.mxu1 %v1402_v1 }
 0xca4   :  { %1129 = vmatpush3.msra.mxu1 %v667_v61 }
 0xca5   :  { %1130 = vmatprep.subr.mxu1 %v1402_v1 }
 0xca6   :  { %1131 = vmatpush3.msra.mxu1 %v666_v62 }
 0xca7   :  { %1132 = vmatprep.subr.mxu1 %v1402_v1 }
 0xca8   :  { %1133 = vmatpush3.msra.mxu1 %v665_v63 }
 0xca9   :  { %1134 = vmatprep.subr.mxu1 %v1402_v1 }
 0xcaa   :  { %1135 = vmatpush3.msra.mxu1 %v664_v0 }
 0xcab   :  { %1136 = vmatprep.subr.mxu1 %v1402_v1 }
 0xcac   :  { %1137 = vmatpush3.msra.mxu1 %v663_v2 }
 0xcad   :  { %1138 = vmatprep.subr.mxu1 %v1402_v1 }
 0xcae   :  { %1139 = vmatpush3.msra.mxu1 %v662_v3 }
 0xcaf   :  { %1140 = vmatprep.subr.mxu1 %v1402_v1 }
 0xcb0   :  { %1141 = vmatpush3.msra.mxu1 %v661_v4 }
 0xcb1   :  { %1142 = vmatprep.subr.mxu1 %v1402_v1 }
 0xcb2   :  { %1143 = vmatpush3.msra.mxu1 %v660_v5 }
 0xcb3   :  { %1144 = vmatprep.subr.mxu1 %v1402_v1 }
 0xcb4   :  { %1145 = vmatpush3.msra.mxu1 %v659_v6 }
 0xcb5   :  { %1146 = vmatprep.subr.mxu1 %v1402_v1 }
 0xcb6   :  { %1147 = vmatpush3.msra.mxu1 %v658_v7 }
 0xcb7   :  { %1148 = vmatprep.subr.mxu1 %v1402_v1 }
 0xcb8   :  { %1149 = vmatpush3.msra.mxu1 %v657_v8 }
 0xcb9   :  { %1151 = vmatmul.mubr.f32.vlgmr.msra.gmra.mxu1 %v1607_v37 }
 0xd79   :  { %v739_v9 = vpop.f32.mrf.mxu1 }
 0xd7a   :  { %v743_v10 = vmax.f32 %v739_v9, 0.0 }
 0xd7b   :  { %v1152_v11 = vpop.f32.mrf.mxu1 }
 0xd7c   :  { %796 = vst [vmem:[#allocation7] sm:$0xff] %v743_v10  ;;  %744 = vadd.xlane.f32.xlu0 %v743_v10 }
 0xe05   :  { %v745_v12 = vpop.xlane.xlu0 %744 }
 0xe06   :  { %v746_v13 = vrot.slane %v745_v12, 4 }
 0xe08   :  { %v747_v14 = vadd.f32 %v746_v13, %v745_v12 }
 0xe0a   :  { %v748_v15 = vrot.slane %v747_v14, 2 }
 0xe0c   :  { %v749_v16 = vadd.f32 %v748_v15, %v747_v14 }
 0xe0e   :  { %v750_v17 = vrot.slane %v749_v16, 1 }
 0xe10   :  { %v751_v18 = vadd.f32 %v750_v17, %v749_v16 }
 0xe12   :  { %1173 = vpush %v751_v18 }
 0xe43   :  { %s1174_s28 = spop %1173 }
 0xe44   :  { %s753_s29 = smul.f32 0.0009765625, %s1174_s28 }
 0xe46   :  { %v754_v19 = vstv %s753_s29 }
 0xe47   :  { %v755_v1 = vsub.f32 %v743_v10, %v754_v19 }
 0xe49   :  { %v756_v20 = vmul.f32 %v755_v1, %v755_v1 }
 0xe4b   :  { %757 = vadd.xlane.f32.xlu0 %v756_v20 }
 0xe4c   :  { %1352 = shalt.err (!%p1349_p5)
}
 0xe4d   :  { %806 = dma.vmem_to_hbm [thread:$0]  %s804_s4, 128, %s1645_s2, [#allocation6]   ;;  %v766_v28 = vlaneseq  ;;  %v769_v30 = vstv %s1487_s5  ;;  %v772_v32 = vstv %s1518_s11  ;;  %v775_v34 = vstv %s1549_s17 }
 0xe4e   :  { %v778_v36 = vstv %s1580_s22  ;;  %v781_v38 = vstv %s1611_s27  ;;  %s1405_s5 = smov [#allocation8]   ;;  %vm794_vm8 = vcmask 40960  }
 0xe4f   :  { %v767_v29 = vand.u32 127, %v766_v28  ;;  %s813_s9 = sshll.u32 %s1405_s5, 4  ;;  %s814_s9 = int_to_ptr.vmem [resolvable:$true] %s813_s9 }
 0xe50   :  { %s1361_s10 = scalar_lea.vmem %s814_s9, 16  ;;  %s1365_s11 = scalar_lea.vmem %s814_s9, 32 }
 0xe51   :  { %vm768_vm1 = vcmp.eq.s32.totalorder %v767_v29, 0  ;;  %vm771_vm2 = vcmp.eq.s32.totalorder %v767_v29, 1  ;;  %vm774_vm3 = vcmp.eq.s32.totalorder %v767_v29, 2  ;;  %vm777_vm4 = vcmp.eq.s32.totalorder %v767_v29, 3  ;;  %p1362_p6 = scmp.ne.s32.totalorder %s814_s9, %s1361_s10  ;;  %p1366_p7 = scmp.lt.s32.totalorder %s814_s9, %s814_s9 }
 0xe52   :  { %v770_v31 = vsel %vm768_vm1, %v769_v30, 0.0  ;;  %vm780_vm5 = vcmp.eq.s32.totalorder %v767_v29, 4  ;;  %vm783_vm6 = vcmp.eq.s32.totalorder %v767_v29, 5  ;;  %p1367_p8 = scmp.lt.s32.totalorder %s1365_s11, %s1361_s10 }
 0xe53   :  { %v773_v33 = vsel %vm771_vm2, %v772_v32, %v770_v31 }
 0xe54   :  { %v776_v35 = vsel %vm774_vm3, %v775_v34, %v773_v33  ;;  %p1368_p9 = por %p1367_p8, %p1366_p7 }
 0xe55   :  { %v779_v37 = vsel %vm777_vm4, %v778_v36, %v776_v35 }
 0xe56   :  { %v782_v39 = vsel %vm780_vm5, %v781_v38, %v779_v37  ;;  %p1369_p10 = pnand %p1368_p9, %p1362_p6 }
 0xed4   :  { %v758_v21 = vpop.xlane.xlu0 %757 }
 0xed5   :  { %v759_v22 = vrot.slane %v758_v21, 4 }
 0xed7   :  { %v760_v23 = vadd.f32 %v759_v22, %v758_v21 }
 0xed9   :  { %v761_v24 = vrot.slane %v760_v23, 2 }
 0xedb   :  { %v762_v25 = vadd.f32 %v761_v24, %v760_v23 }
 0xedd   :  { %v763_v26 = vrot.slane %v762_v25, 1 }
 0xedf   :  { %v764_v27 = vadd.f32 %v763_v26, %v762_v25 }
 0xee1   :  { %1175 = vpush %v764_v27 }
 0xf12   :  { %s1176_s2 = spop %1175 }
 0xf13   :  { %v784_v40 = vstv %s1176_s2 }
 0xf14   :  { %v785_v41 = vsel %vm783_vm6, %v784_v40, %v782_v39 }
 0xf15   :  { %v786_v42 = vmul.f32 0.0009775171, %v785_v41 }
 0xf17   :  { %1184 = vrsqrt.f32 %v786_v42  ;;  %vm789_vm7 = vcmp.eq.f32.partialorder %v786_v42, inf  ;;  %v792_v45 = vand.u32 2147483648, %v786_v42  ;;  %vm791_vm9 = vcmp.eq.f32.partialorder %v786_v42, 0.0 }
 0xf24   :  { %v1185_v43 = vpop.eup %1184 }
 0xf25   :  { %v788_v44 = vmul.f32 %v1185_v43, %v786_v42 }
 0xf27   :  { %v790_v46 = vsel %vm789_vm7, %v786_v42, %v788_v44 }
 0xf28   :  { %v793_v47 = vsel %vm791_vm9, %v792_v45, %v790_v46 }
 0xf29   :  { %795 = vst.msk [vmem:[#allocation8] sm:$0x1] %vm794_vm8, %v793_v47 }
 0xf2a   :  { %1372 = shalt.err (!%p1369_p10)
}
 0xf2b   :  { %816 = dma.vmem_to_hbm [thread:$0]  %s814_s9, 16, %s1646_s3, [#allocation9]  }
 0xf2c   :  { %1395 = dma.done.wait [#allocation6], 128  }
 0xf2d   :  { %1396 = vsyncadd [#allocation6], 4294967168 }
 0xf2e   :  { %1397 = dma.done.wait [#allocation9], 16  }
 0xf2f   :  { %1398 = vsyncadd [#allocation9], 4294967280 }
 0xf30   :  { %823 = vsyncpa [#allocation5], 1 }
 0xf31   :  { %824 = vsyncpa [#allocation6], 1 }
 0xf32   :  { %825 = vsyncpa [#allocation9], 1 }
 0xf33   :  { %826 = vsyncmov [#allocation3] }
 0xf36   :  { %s827_s14 = vpop.sfrf %826 }
 0xf37   :  { %p839_p11 = scmp.ne.s32.totalorder %s827_s14, 0 }
 0xf39   :  { %831 = shalt.err (%p839_p11)  }
 0xf3a   :  { %833 = vsyncmov [#allocation3 + $0x1] }
 0xf3d   :  { %s834_s15 = vpop.sfrf %833 }
 0xf3e   :  { %p840_p12 = scmp.ne.s32.totalorder %s834_s15, 0 }
 0xf40   :  { %838 = shalt.err (%p840_p12)  }

</bundles_post_ra>
